<compile_context>
chip_gen: v5e
topology: v5e:2x2
jax: 0.10.0
libtpu: 0.0.40
codegen_flags: <defaults>
</compile_context>

<pallas_src>
import jax
import jax.numpy as jnp
from jax import lax
from jax.experimental import pallas as pl
from jax.experimental.pallas import tpu as pltpu


LANE = 128      # TPU lane width; also the lane-axis halo size
CP = 8          # channel rows padded to one full f32 sublane tile


def _make_basic_block_kernel(N, H, W, C, Lp, eps=1e-5):
    Hp, Wp = H + 2, W + 2
    P = Hp * Wp
    L = N * P
    pad = LANE
    inv_count = 1.0 / float(N * H * W)
    # 3x3 taps as static flat-pixel (lane) offsets in the padded layout.
    offs = [(ky - 1) * Wp + (kx - 1) for ky in range(3) for kx in range(3)]

    def kernel(x_ref, w1_ref, w2_ref, g1_ref, b1_ref, g2_ref, b2_ref, out_ref):
        # ---- validity mask over the pixel (lane) axis, built in-kernel ------
        # lane l = n*P + hp*Wp + wp; valid iff 1<=hp<=H, 1<=wp<=W and l < L
        # (excludes the spatial pad ring and the Lp-L lane padding).  Float
        # floor-div with a +0.5 guard avoids integer vector division; the
        # margin (0.5/P ~ 1.5e-3) dwarfs f32 rounding (~3e-7) at these sizes.
        i = lax.broadcasted_iota(jnp.int32, (1, Lp), 1).astype(jnp.float32)
        n_idx = jnp.floor((i + 0.5) * (1.0 / P))
        p = i - n_idx * P
        hp = jnp.floor((p + 0.5) * (1.0 / Wp))
        wp = p - hp * Wp
        valid = ((hp >= 1.0) & (hp <= float(H)) &
                 (wp >= 1.0) & (wp <= float(W)) & (i < float(L)))
        # Hoisted once and reused (no re-emitted broadcasts per use).
        mask = jnp.broadcast_to(valid.astype(jnp.float32), (CP, Lp))

        # relu(x) on the halo-extended input; relu keeps the zero pad ring,
        # the lane halo and the padded channel rows exactly zero.
        xh = jnp.maximum(x_ref[...], 0.0)            # (CP, Le) f32
        residual = xh[:, pad:pad + Lp]               # lane-aligned slice

        def conv_bn(src_e, w_ref, g_ref, b_ref):
            # src_e: (CP, Le) halo-extended, finite everywhere.
            # im2col: 9 statically shifted lane views, packed in registers
            # (8-aligned sublane concat) and cast to bf16 exactly once.
            pieces = [src_e[:, pad + o: pad + o + Lp] for o in offs]
            patches = jnp.concatenate(pieces, axis=0).astype(jnp.bfloat16)
            # ONE fused MXU matmul per conv: (CP, 9*CP) @ (9*CP, Lp).
            acc = jnp.dot(w_ref[...], patches,
                          preferred_element_type=jnp.float32)    # (CP, Lp) f32
            # Single-pass masked BN stats over the N*H*W valid pixels.
            am = acc * mask
            s1 = jnp.sum(am, axis=1, keepdims=True)
            s2 = jnp.sum(am * acc, axis=1, keepdims=True)        # sum of x^2
            mean = s1 * inv_count
            var = s2 * inv_count - mean * mean
            return (acc - mean) * lax.rsqrt(var + eps) * g_ref[...] + b_ref[...]

        # conv1 -> bn1 -> relu; re-zero the pad ring so conv2 sees zero padding
        y1 = jnp.maximum(conv_bn(xh, w1_ref, g1_ref, b1_ref), 0.0) * mask

        # conv2 halo: one aligned 128-lane zero vreg per side.  Valid output
        # pixels never read the halo (it only feeds pad-ring columns, which
        # are masked out of BN stats and cropped by the wrapper).
        halo = jnp.zeros((CP, pad), jnp.float32)
        y1e = jnp.concatenate([halo, y1, halo], axis=1)          # (CP, Le)
        y2 = conv_bn(y1e, w2_ref, g2_ref, b2_ref)

        # Residual add.  Pad-ring / padded lanes carry don't-care (finite)
        # values which the wrapper crops; keep that crop if this is re-tiled.
        out_ref[...] = y2 + residual

    return kernel


def basic_block_forward(x, params, features=None):
    """x: (N, C, H, W) float32 NCHW (as in PyTorch). Returns (out, features+[out])."""
    if features is None:
        features = []
    w1_mat, w2_mat, g1, b1, g2, b2 = params
    N, C, H, W = x.shape
    Hp, Wp = H + 2, W + 2
    L = N * Hp * Wp
    Lp = ((L + LANE - 1) // LANE) * LANE          # lane-padded pixel count
    Le = Lp + 2 * LANE                            # + 128-lane zero halo per side
    assert C <= CP

    # Glue: NCHW -> spatial zero-pad -> channels-on-sublanes (C, L) -> pad
    # channels to 8 sublanes, lanes to Lp, plus the 128-lane halo.
    # TODO(synk): at production ResNet shapes, build this packed layout
    # in-kernel (BlockSpec(memory_space=pl.ANY) + per-tile DMA) instead of
    # full-array HBM relayout passes before the kernel.
    x_pad = jnp.pad(x.astype(jnp.float32), ((0, 0), (0, 0), (1, 1), (1, 1)))
    x_t = jnp.transpose(x_pad, (1, 0, 2, 3)).reshape(C, L)
    x_e = jnp.pad(x_t, ((0, CP - C), (LANE, Le - LANE - L)))      # (CP, Le)

    kernel = _make_basic_block_kernel(N, H, W, C, Lp)
    vmem = lambda: pl.BlockSpec(memory_space=pltpu.MemorySpace.VMEM)

    flops = 2 * (2 * CP * (9 * CP) * Lp)          # two fused im2col matmuls
    bytes_accessed = (x_e.size * 4 + (w1_mat.size + w2_mat.size) * 2
                      + 4 * CP * 4 + CP * Lp * 4)

    # TODO(synk): for production shapes (e.g. C=64, 56x56, N=32) tile the
    # pixel axis with a grid ("parallel" so both v7x TensorCores work;
    # partial BN sums accumulated over an "arbitrary" axis, finalized under
    # pl.when), size tiles against pltpu.get_tpu_info() VMEM and raise
    # vmem_limit_bytes above the 16/32/32 MiB v5e/v6e/v7x defaults.  At this
    # toy size everything is VMEM-resident and a grid would only add overhead.
    out_t = pl.pallas_call(
        kernel,
        out_shape=jax.ShapeDtypeStruct((CP, Lp), jnp.float32),
        in_specs=[vmem() for _ in range(7)],
        out_specs=vmem(),
        cost_estimate=pl.CostEstimate(flops=flops, transcendentals=2 * CP,
                                      bytes_accessed=bytes_accessed),
    )(x_e, w1_mat, w2_mat, g1, b1, g2, b2)

    # Crop padded channels / lane padding, drop the spatial pad ring, -> NCHW.
    out_pad = out_t[:C, :L].reshape(C, N, Hp, Wp)
    out = jnp.transpose(out_pad, (1, 0, 2, 3))[:, :, 1:Hp - 1, 1:Wp - 1]
    return out, features + [out]


def _pack_conv_weight(w_oihw, C):
    """(O, I, 3, 3) OIHW -> (CP, 9*CP) bf16; column t*CP + i holds tap
    t = ky*3+kx of input channel i; padded rows/columns are zero."""
    w_t = jnp.transpose(w_oihw, (0, 2, 3, 1))                     # (O, ky, kx, I)
    w_t = jnp.pad(w_t, ((0, CP - C), (0, 0), (0, 0), (0, CP - C)))
    return w_t.reshape(CP, 9 * CP).astype(jnp.bfloat16)


def _pack_bn_param(v, C):
    return jnp.pad(v.reshape(C, 1), ((0, CP - C), (0, 0))).astype(jnp.float32)


def _reference_forward(x, w1_oihw, w2_oihw, g1, b1, g2, b2, eps=1e-5):
    """Pure-JAX reference mirroring the PyTorch module (training-mode BN).
    Conv operands are cast to bf16 with f32 accumulation to match the kernel's
    MXU precision policy; BN, relu and the residual add are f32."""
    def conv3x3(a, w):
        return lax.conv_general_dilated(
            a.astype(jnp.bfloat16), w.astype(jnp.bfloat16),
            window_strides=(1, 1), padding=((1, 1), (1, 1)),
            dimension_numbers=('NCHW', 'OIHW', 'NCHW'),
            preferred_element_type=jnp.float32)

    def bn(a, g, b):
        mean = jnp.mean(a, axis=(0, 2, 3), keepdims=True)
        var = jnp.mean((a - mean) ** 2, axis=(0, 2, 3), keepdims=True)
        return ((a - mean) * lax.rsqrt(var + eps) * g.reshape(1, -1, 1, 1)
                + b.reshape(1, -1, 1, 1))

    xr = jnp.maximum(x, 0.0)
    out = jnp.maximum(bn(conv3x3(xr, w1_oihw), g1, b1), 0.0)
    out = bn(conv3x3(out, w2_oihw), g2, b2)
    return out + xr


if __name__ == "__main__":
    # small shapes consistent with the module: inplanes = planes = 4, stride = 1
    N, C, H, W = 2, 4, 16, 16

    key = jax.random.PRNGKey(0)
    kx, kw1, kw2, kg1, kb1, kg2, kb2 = jax.random.split(key, 7)

    x = jax.random.normal(kx, (N, C, H, W), jnp.float32)
    # conv weights in PyTorch OIHW layout: (planes, inplanes, 3, 3), bias=False
    w1_oihw = jax.random.normal(kw1, (C, C, 3, 3), jnp.float32) * 0.2
    w2_oihw = jax.random.normal(kw2, (C, C, 3, 3), jnp.float32) * 0.2
    # BatchNorm affine parameters (deterministic, non-trivial)
    g1 = 1.0 + 0.1 * jax.random.normal(kg1, (C,), jnp.float32)
    b1 = 0.1 * jax.random.normal(kb1, (C,), jnp.float32)
    g2 = 1.0 + 0.1 * jax.random.normal(kg2, (C,), jnp.float32)
    b2 = 0.1 * jax.random.normal(kb2, (C,), jnp.float32)

    params = (_pack_conv_weight(w1_oihw, C), _pack_conv_weight(w2_oihw, C),
              _pack_bn_param(g1, C), _pack_bn_param(b1, C),
              _pack_bn_param(g2, C), _pack_bn_param(b2, C))

    out, feats = basic_block_forward(x, params)
    out = jax.block_until_ready(out)

    ref = _reference_forward(x, w1_oihw, w2_oihw, g1, b1, g2, b2)
    err = float(jnp.max(jnp.abs(out - ref)))
    assert out.shape == (N, C, H, W)
    assert len(feats) == 1
    # bf16 MXU operands on both sides; BN/relu/residual in f32 -> tight agreement.
    assert err < 5e-3, f"mismatch vs reference: {err}"

    print("KERNEL_OK")
</pallas_src>

<mosaic_0001>
module attributes {stable_mosaic.version = 11 : i64} {
  func.func @kernel(%arg0: memref<8x1024xf32, #tpu.memory_space<vmem>>, %arg1: memref<8x72xbf16, #tpu.memory_space<vmem>>, %arg2: memref<8x72xbf16, #tpu.memory_space<vmem>>, %arg3: memref<8x1xf32, #tpu.memory_space<vmem>>, %arg4: memref<8x1xf32, #tpu.memory_space<vmem>>, %arg5: memref<8x1xf32, #tpu.memory_space<vmem>>, %arg6: memref<8x1xf32, #tpu.memory_space<vmem>>, %arg7: memref<8x768xf32, #tpu.memory_space<vmem>>) attributes {dimension_semantics = [], scalar_prefetch = 0 : i64, scratch_operands = 0 : i64, tpu.core_type = #tpu.core_type<tc>} {
    %0 = tpu.iota {dimensions = array<i32: 1>} : vector<1x768xi32>
    %1 = arith.sitofp %0 : vector<1x768xi32> to vector<1x768xf32>
    %cst = arith.constant 5.000000e-01 : f32
    %2 = vector.broadcast %cst : f32 to vector<1x768xf32>
    %3 = arith.addf %1, %2 : vector<1x768xf32>
    %cst_0 = arith.constant 0.00308641978 : f32
    %4 = vector.broadcast %cst_0 : f32 to vector<1x768xf32>
    %5 = arith.mulf %3, %4 : vector<1x768xf32>
    %6 = math.floor %5 : vector<1x768xf32>
    %cst_1 = arith.constant 3.240000e+02 : f32
    %7 = vector.broadcast %cst_1 : f32 to vector<1x768xf32>
    %8 = arith.mulf %6, %7 : vector<1x768xf32>
    %9 = arith.subf %1, %8 : vector<1x768xf32>
    %cst_2 = arith.constant 5.000000e-01 : f32
    %10 = vector.broadcast %cst_2 : f32 to vector<1x768xf32>
    %11 = arith.addf %9, %10 : vector<1x768xf32>
    %cst_3 = arith.constant 0.055555556 : f32
    %12 = vector.broadcast %cst_3 : f32 to vector<1x768xf32>
    %13 = arith.mulf %11, %12 : vector<1x768xf32>
    %14 = math.floor %13 : vector<1x768xf32>
    %cst_4 = arith.constant 1.800000e+01 : f32
    %15 = vector.broadcast %cst_4 : f32 to vector<1x768xf32>
    %16 = arith.mulf %14, %15 : vector<1x768xf32>
    %17 = arith.subf %9, %16 : vector<1x768xf32>
    %cst_5 = arith.constant 1.000000e+00 : f32
    %18 = vector.broadcast %cst_5 : f32 to vector<1x768xf32>
    %19 = arith.cmpf oge, %14, %18 : vector<1x768xf32>
    %cst_6 = arith.constant 1.600000e+01 : f32
    %20 = vector.broadcast %cst_6 : f32 to vector<1x768xf32>
    %21 = arith.cmpf ole, %14, %20 : vector<1x768xf32>
    %22 = arith.andi %19, %21 : vector<1x768xi1>
    %cst_7 = arith.constant 1.000000e+00 : f32
    %23 = vector.broadcast %cst_7 : f32 to vector<1x768xf32>
    %24 = arith.cmpf oge, %17, %23 : vector<1x768xf32>
    %25 = arith.andi %22, %24 : vector<1x768xi1>
    %cst_8 = arith.constant 1.600000e+01 : f32
    %26 = vector.broadcast %cst_8 : f32 to vector<1x768xf32>
    %27 = arith.cmpf ole, %17, %26 : vector<1x768xf32>
    %28 = arith.andi %25, %27 : vector<1x768xi1>
    %cst_9 = arith.constant 6.480000e+02 : f32
    %29 = vector.broadcast %cst_9 : f32 to vector<1x768xf32>
    %30 = arith.cmpf olt, %1, %29 : vector<1x768xf32>
    %31 = arith.andi %28, %30 : vector<1x768xi1>
    %32 = arith.extui %31 : vector<1x768xi1> to vector<1x768xi32>
    %33 = arith.sitofp %32 : vector<1x768xi32> to vector<1x768xf32>
    %34 = vector.shape_cast %33 : vector<1x768xf32> to vector<1x768xf32>
    %35 = vector.broadcast %34 : vector<1x768xf32> to vector<8x768xf32>
    %c0 = arith.constant 0 : index
    %c0_10 = arith.constant 0 : index
    %36 = vector.load %arg0[%c0, %c0_10] : memref<8x1024xf32, #tpu.memory_space<vmem>>, vector<8x1024xf32>
    %cst_11 = arith.constant 0.000000e+00 : f32
    %37 = vector.broadcast %cst_11 : f32 to vector<8x1024xf32>
    %38 = arith.maximumf %36, %37 : vector<8x1024xf32>
    %39 = vector.extract_strided_slice %38 {offsets = [0, 128], sizes = [8, 768], strides = [1, 1]} : vector<8x1024xf32> to vector<8x768xf32>
    %40 = vector.extract_strided_slice %38 {offsets = [0, 109], sizes = [8, 768], strides = [1, 1]} : vector<8x1024xf32> to vector<8x768xf32>
    %41 = vector.extract_strided_slice %38 {offsets = [0, 110], sizes = [8, 768], strides = [1, 1]} : vector<8x1024xf32> to vector<8x768xf32>
    %42 = vector.extract_strided_slice %38 {offsets = [0, 111], sizes = [8, 768], strides = [1, 1]} : vector<8x1024xf32> to vector<8x768xf32>
    %43 = vector.extract_strided_slice %38 {offsets = [0, 127], sizes = [8, 768], strides = [1, 1]} : vector<8x1024xf32> to vector<8x768xf32>
    %44 = vector.extract_strided_slice %38 {offsets = [0, 128], sizes = [8, 768], strides = [1, 1]} : vector<8x1024xf32> to vector<8x768xf32>
    %45 = vector.extract_strided_slice %38 {offsets = [0, 129], sizes = [8, 768], strides = [1, 1]} : vector<8x1024xf32> to vector<8x768xf32>
    %46 = vector.extract_strided_slice %38 {offsets = [0, 145], sizes = [8, 768], strides = [1, 1]} : vector<8x1024xf32> to vector<8x768xf32>
    %47 = vector.extract_strided_slice %38 {offsets = [0, 146], sizes = [8, 768], strides = [1, 1]} : vector<8x1024xf32> to vector<8x768xf32>
    %48 = vector.extract_strided_slice %38 {offsets = [0, 147], sizes = [8, 768], strides = [1, 1]} : vector<8x1024xf32> to vector<8x768xf32>
    %49 = tpu.concatenate %40, %41, %42, %43, %44, %45, %46, %47, %48 in 0 : vector<8x768xf32>, vector<8x768xf32>, vector<8x768xf32>, vector<8x768xf32>, vector<8x768xf32>, vector<8x768xf32>, vector<8x768xf32>, vector<8x768xf32>, vector<8x768xf32> -> vector<72x768xf32>
    %50 = arith.truncf %49 : vector<72x768xf32> to vector<72x768xbf16>
    %c0_12 = arith.constant 0 : index
    %c0_13 = arith.constant 0 : index
    %51 = vector.load %arg1[%c0_12, %c0_13] : memref<8x72xbf16, #tpu.memory_space<vmem>>, vector<8x72xbf16>
    %cst_14 = arith.constant dense<0.000000e+00> : vector<8x768xf32>
    %52 = tpu.matmul %51, %50, %cst_14 {dimension_numbers = #tpu.dot_dimension_numbers<[1], [0], [0], [1], [0, 0, 1, 1], [], []>} : vector<8x72xbf16>, vector<72x768xbf16>, vector<8x768xf32> -> vector<8x768xf32>
    %53 = arith.mulf %52, %35 : vector<8x768xf32>
    %cst_15 = arith.constant dense<0.000000e+00> : vector<8xf32>
    %54 = vector.multi_reduction <add>, %53, %cst_15 [1] : vector<8x768xf32> to vector<8xf32>
    %55 = vector.shape_cast %54 : vector<8xf32> to vector<8x1xf32>
    %56 = arith.mulf %53, %52 : vector<8x768xf32>
    %cst_16 = arith.constant dense<0.000000e+00> : vector<8xf32>
    %57 = vector.multi_reduction <add>, %56, %cst_16 [1] : vector<8x768xf32> to vector<8xf32>
    %58 = vector.shape_cast %57 : vector<8xf32> to vector<8x1xf32>
    %cst_17 = arith.constant 0.001953125 : f32
    %59 = vector.broadcast %cst_17 : f32 to vector<8x1xf32>
    %60 = arith.mulf %55, %59 : vector<8x1xf32>
    %cst_18 = arith.constant 0.001953125 : f32
    %61 = vector.broadcast %cst_18 : f32 to vector<8x1xf32>
    %62 = arith.mulf %58, %61 : vector<8x1xf32>
    %63 = arith.mulf %60, %60 : vector<8x1xf32>
    %64 = arith.subf %62, %63 : vector<8x1xf32>
    %65 = vector.broadcast %60 : vector<8x1xf32> to vector<8x768xf32>
    %66 = arith.subf %52, %65 : vector<8x768xf32>
    %cst_19 = arith.constant 9.99999974E-6 : f32
    %67 = vector.broadcast %cst_19 : f32 to vector<8x1xf32>
    %68 = arith.addf %64, %67 : vector<8x1xf32>
    %69 = math.rsqrt %68 : vector<8x1xf32>
    %70 = vector.broadcast %69 : vector<8x1xf32> to vector<8x768xf32>
    %71 = arith.mulf %66, %70 : vector<8x768xf32>
    %c0_20 = arith.constant 0 : index
    %c0_21 = arith.constant 0 : index
    %72 = vector.load %arg3[%c0_20, %c0_21] : memref<8x1xf32, #tpu.memory_space<vmem>>, vector<8x1xf32>
    %73 = vector.broadcast %72 : vector<8x1xf32> to vector<8x768xf32>
    %74 = arith.mulf %71, %73 : vector<8x768xf32>
    %c0_22 = arith.constant 0 : index
    %c0_23 = arith.constant 0 : index
    %75 = vector.load %arg4[%c0_22, %c0_23] : memref<8x1xf32, #tpu.memory_space<vmem>>, vector<8x1xf32>
    %76 = vector.broadcast %75 : vector<8x1xf32> to vector<8x768xf32>
    %77 = arith.addf %74, %76 : vector<8x768xf32>
    %cst_24 = arith.constant 0.000000e+00 : f32
    %78 = vector.broadcast %cst_24 : f32 to vector<8x768xf32>
    %79 = arith.maximumf %77, %78 : vector<8x768xf32>
    %80 = arith.mulf %79, %35 : vector<8x768xf32>
    %cst_25 = arith.constant 0.000000e+00 : f32
    %81 = vector.broadcast %cst_25 : f32 to vector<8x128xf32>
    %82 = tpu.concatenate %81, %80, %81 in 1 : vector<8x128xf32>, vector<8x768xf32>, vector<8x128xf32> -> vector<8x1024xf32>
    %83 = vector.extract_strided_slice %82 {offsets = [0, 109], sizes = [8, 768], strides = [1, 1]} : vector<8x1024xf32> to vector<8x768xf32>
    %84 = vector.extract_strided_slice %82 {offsets = [0, 110], sizes = [8, 768], strides = [1, 1]} : vector<8x1024xf32> to vector<8x768xf32>
    %85 = vector.extract_strided_slice %82 {offsets = [0, 111], sizes = [8, 768], strides = [1, 1]} : vector<8x1024xf32> to vector<8x768xf32>
    %86 = vector.extract_strided_slice %82 {offsets = [0, 127], sizes = [8, 768], strides = [1, 1]} : vector<8x1024xf32> to vector<8x768xf32>
    %87 = vector.extract_strided_slice %82 {offsets = [0, 128], sizes = [8, 768], strides = [1, 1]} : vector<8x1024xf32> to vector<8x768xf32>
    %88 = vector.extract_strided_slice %82 {offsets = [0, 129], sizes = [8, 768], strides = [1, 1]} : vector<8x1024xf32> to vector<8x768xf32>
    %89 = vector.extract_strided_slice %82 {offsets = [0, 145], sizes = [8, 768], strides = [1, 1]} : vector<8x1024xf32> to vector<8x768xf32>
    %90 = vector.extract_strided_slice %82 {offsets = [0, 146], sizes = [8, 768], strides = [1, 1]} : vector<8x1024xf32> to vector<8x768xf32>
    %91 = vector.extract_strided_slice %82 {offsets = [0, 147], sizes = [8, 768], strides = [1, 1]} : vector<8x1024xf32> to vector<8x768xf32>
    %92 = tpu.concatenate %83, %84, %85, %86, %87, %88, %89, %90, %91 in 0 : vector<8x768xf32>, vector<8x768xf32>, vector<8x768xf32>, vector<8x768xf32>, vector<8x768xf32>, vector<8x768xf32>, vector<8x768xf32>, vector<8x768xf32>, vector<8x768xf32> -> vector<72x768xf32>
    %93 = arith.truncf %92 : vector<72x768xf32> to vector<72x768xbf16>
    %c0_26 = arith.constant 0 : index
    %c0_27 = arith.constant 0 : index
    %94 = vector.load %arg2[%c0_26, %c0_27] : memref<8x72xbf16, #tpu.memory_space<vmem>>, vector<8x72xbf16>
    %cst_28 = arith.constant dense<0.000000e+00> : vector<8x768xf32>
    %95 = tpu.matmul %94, %93, %cst_28 {dimension_numbers = #tpu.dot_dimension_numbers<[1], [0], [0], [1], [0, 0, 1, 1], [], []>} : vector<8x72xbf16>, vector<72x768xbf16>, vector<8x768xf32> -> vector<8x768xf32>
    %96 = arith.mulf %95, %35 : vector<8x768xf32>
    %cst_29 = arith.constant dense<0.000000e+00> : vector<8xf32>
    %97 = vector.multi_reduction <add>, %96, %cst_29 [1] : vector<8x768xf32> to vector<8xf32>
    %98 = vector.shape_cast %97 : vector<8xf32> to vector<8x1xf32>
    %99 = arith.mulf %96, %95 : vector<8x768xf32>
    %cst_30 = arith.constant dense<0.000000e+00> : vector<8xf32>
    %100 = vector.multi_reduction <add>, %99, %cst_30 [1] : vector<8x768xf32> to vector<8xf32>
    %101 = vector.shape_cast %100 : vector<8xf32> to vector<8x1xf32>
    %cst_31 = arith.constant 0.001953125 : f32
    %102 = vector.broadcast %cst_31 : f32 to vector<8x1xf32>
    %103 = arith.mulf %98, %102 : vector<8x1xf32>
    %cst_32 = arith.constant 0.001953125 : f32
    %104 = vector.broadcast %cst_32 : f32 to vector<8x1xf32>
    %105 = arith.mulf %101, %104 : vector<8x1xf32>
    %106 = arith.mulf %103, %103 : vector<8x1xf32>
    %107 = arith.subf %105, %106 : vector<8x1xf32>
    %108 = vector.broadcast %103 : vector<8x1xf32> to vector<8x768xf32>
    %109 = arith.subf %95, %108 : vector<8x768xf32>
    %cst_33 = arith.constant 9.99999974E-6 : f32
    %110 = vector.broadcast %cst_33 : f32 to vector<8x1xf32>
    %111 = arith.addf %107, %110 : vector<8x1xf32>
    %112 = math.rsqrt %111 : vector<8x1xf32>
    %113 = vector.broadcast %112 : vector<8x1xf32> to vector<8x768xf32>
    %114 = arith.mulf %109, %113 : vector<8x768xf32>
    %c0_34 = arith.constant 0 : index
    %c0_35 = arith.constant 0 : index
    %115 = vector.load %arg5[%c0_34, %c0_35] : memref<8x1xf32, #tpu.memory_space<vmem>>, vector<8x1xf32>
    %116 = vector.broadcast %115 : vector<8x1xf32> to vector<8x768xf32>
    %117 = arith.mulf %114, %116 : vector<8x768xf32>
    %c0_36 = arith.constant 0 : index
    %c0_37 = arith.constant 0 : index
    %118 = vector.load %arg6[%c0_36, %c0_37] : memref<8x1xf32, #tpu.memory_space<vmem>>, vector<8x1xf32>
    %119 = vector.broadcast %118 : vector<8x1xf32> to vector<8x768xf32>
    %120 = arith.addf %117, %119 : vector<8x768xf32>
    %121 = arith.addf %120, %39 : vector<8x768xf32>
    %c0_38 = arith.constant 0 : index
    %c0_39 = arith.constant 0 : index
    %122 = vector.load %arg7[%c0_38, %c0_39] : memref<8x768xf32, #tpu.memory_space<vmem>>, vector<8x768xf32>
    tpu.vector_store %arg7[%c0_38, %c0_39], %121 {strides = array<i32>} : memref<8x768xf32, #tpu.memory_space<vmem>>, vector<8x768xf32>,
    return
  }
}

</mosaic_0001>

<bundles_post_ra>
// kernel: tpu_custom_call.1
= control target key start
LH: loop header
LB: loop body
LE: loop exit
PB: predicated region body
PF: predicated region fallthrough
CT: control target
= control target key end

     0   :  { %12 = vsyncpa [#allocation3], 0  ;;  %s2540_s0 = inlined_call_operand.hbm [shape: f32[8,1024], index: 0, kind: input, shape index: {}]   ;;  %s2541_s1 = inlined_call_operand.vmem [shape: bf16[8,72], index: 1, kind: input, shape index: {}]   ;;  %s2542_s2 = inlined_call_operand.vmem [shape: bf16[8,72], index: 2, kind: input, shape index: {}]   ;;  %s2543_s3 = inlined_call_operand.vmem [shape: f32[8,1], index: 3, kind: input, shape index: {}]   ;;  %s2544_s4 = inlined_call_operand.vmem [shape: f32[8,1], index: 4, kind: input, shape index: {}]   ;;  %s2545_s5 = inlined_call_operand.vmem [shape: f32[8,1], index: 5, kind: input, shape index: {}]   ;;  %s2546_s6 = inlined_call_operand.vmem [shape: f32[8,1], index: 6, kind: input, shape index: {}]   ;;  %s2547_s7 = inlined_call_operand.hbm [shape: f32[8,768], index: 7, kind: output, shape index: {}]  }
   0x1   :  { %13 = vsyncpa [#allocation4], 0  ;;  %s19_s26 = sshll.u32 %s2540_s0, 4  ;;  %s1761_s27 = smov [#allocation2]   ;;  %s20_s26 = int_to_ptr.hbm [resolvable:$true] %s19_s26 }
   0x2   :  { %s21_s28 = sshll.u32 %s1761_s27, 4  ;;  %s22_s28 = int_to_ptr.vmem [resolvable:$true] %s21_s28 }
   0x3   :  { %24 = dma.hbm_to_vmem [thread:$0]  %s20_s26, 1024, %s22_s28, [#allocation3]  }
   0x4   :  { %1757 = dma.done.wait [#allocation3], 1024  }
   0x5   :  { %1758 = vsyncadd [#allocation3], 4294966272  ;;  %v182_v0 = vld [vmem:[#allocation2 + $0x8] sm:$0xff]  ;;  %v183_v1 = vld [vmem:[#allocation2 + $0x10] sm:$0xff]  ;;  %s1762_s0 = smov 92   ;;  %s1763_s29 = smov 90  }
   0x6   :  { %v184_v2 = vld [vmem:[#allocation2 + $0x18] sm:$0xff]  ;;  %v1817_v3 = vmax.f32 %v182_v0, 0.0  ;;  %v1819_v4 = vmax.f32 %v183_v1, 0.0  ;;  %v185_v5 = vld [vmem:[#allocation2 + $0x20] sm:$0xff]  ;;  %v186_v10 = vld [vmem:[#allocation2 + $0x28] sm:$0xff]  ;;  %s1764_s30 = smov 91  }
   0x7   :  { %v1821_v6 = vmax.f32 %v184_v2, 0.0  ;;  %v1823_v7 = vmax.f32 %v185_v5, 0.0  ;;  %v187_v11 = vld [vmem:[#allocation2 + $0x30] sm:$0xff]  ;;  %v1834_v12 = vmax.f32 %v186_v10, 0.0  ;;  %v1841_v15 = vld [vmem:[#allocation2] sm:$0xff]  ;;  %s1765_s8 = smov 109  }
   0x8   :  { %v1473_v8 = vpack.i.bf16 %v1819_v4, %v1817_v3  ;;  %v1836_v13 = vmax.f32 %v187_v11, 0.0  ;;  %s1766_s9 = smov 108   ;;  %v189_v16 = vmax.f32 %v1841_v15, 0.0  ;;  %s1767_s10 = smov 126   ;;  %v188_v19 = vld [vmem:[#allocation2 + $0x38] sm:$0xff]  ;;  %vm2558_vm0 = vcmask 736256  }
   0x9   :  { %v1483_v9 = vpack.i.bf16 %v1823_v7, %v1821_v6  ;;  %v1523_v18 = vpack.i.bf16 %v1821_v6, %v1819_v4  ;;  %s1768_s11 = smov 110   ;;  %s1769_s12 = smov 127   ;;  %v196_v20 = vmax.f32 %v188_v19, 0.0  ;;  %v1568_v21 = vpack.i.bf16 %v1834_v12, %v1823_v7 }
   0xa   :  { %1474 = vrot.lane.b32.xlu1 %v1473_v8, %s1762_s0  ;;  %1464 = vrot.lane.b32.xlu0 %v1473_v8, %s1763_s29  ;;  %v1493_v14 = vpack.i.bf16 %v1836_v13, %v1834_v12  ;;  %v1518_v17 = vpack.i.bf16 %v1817_v3, %v189_v16  ;;  %s1770_s13 = smov 19   ;;  %vm2557_vm1 = vcmask 752640   ;;  %vm2556_vm2 = vcmask 744448   ;;  %s1422_s24 = sshll.u32 %s2547_s7, 4  ;;  %s1423_s24 = int_to_ptr.hbm [resolvable:$true] %s1422_s24 }
   0xb   :  { %1484 = vrot.lane.b32.xlu2 %v1483_v9, %s1762_s0  ;;  %vm2555_vm3 = vcmask 891904   ;;  %vm2554_vm4 = vcmask 883712   ;;  %vm2553_vm5 = vcmask 1031168   ;;  %vm2552_vm6 = vcmask 900096  }
   0xc   :  { %vm2551_vm7 = vcmask 1039360   ;;  %vm2550_vm8 = vcmask 154624   ;;  %vm2549_vm9 = vcmask 1043456   ;;  %vm2548_vm10 = vcmask 588800  }
  0x12   :  { %1479 = vrot.lane.b32.xlu1 %v1473_v8, %s1764_s30  ;;  %1469 = vrot.lane.b32.xlu0 %v1483_v9, %s1763_s29 }
  0x13   :  { %1489 = vrot.lane.b32.xlu2 %v1483_v9, %s1764_s30 }
  0x1a   :  { %1499 = vrot.lane.b32.xlu1 %v1473_v8, %s1765_s8  ;;  %1494 = vrot.lane.b32.xlu0 %v1493_v14, %s1763_s29 }
  0x1b   :  { %1504 = vrot.lane.b32.xlu2 %v1473_v8, %s1766_s9 }
  0x22   :  { %1514 = vrot.lane.b32.xlu1 %v1483_v9, %s1766_s9  ;;  %1509 = vrot.lane.b32.xlu0 %v1483_v9, %s1765_s8 }
  0x23   :  { %1519 = vrot.lane.b32.xlu2 %v1518_v17, %s1767_s10 }
  0x2a   :  { %1524 = vrot.lane.b32.xlu0 %v1523_v18, %s1767_s10  ;;  %1529 = vrot.lane.b32.xlu1 %v1518_v17, %s1768_s11 }
  0x2b   :  { %1534 = vrot.lane.b32.xlu2 %v1523_v18, %s1768_s11 }
  0x32   :  { %1539 = vrot.lane.b32.xlu0 %v1493_v14, %s1762_s0  ;;  %1544 = vrot.lane.b32.xlu1 %v1493_v14, %s1764_s30 }
  0x33   :  { %1549 = vrot.lane.b32.xlu2 %v1518_v17, %s1769_s12 }
  0x3a   :  { %1554 = vrot.lane.b32.xlu0 %v1523_v18, %s1769_s12  ;;  %1559 = vrot.lane.b32.xlu1 %v1493_v14, %s1765_s8 }
  0x3b   :  { %1564 = vrot.lane.b32.xlu2 %v1493_v14, %s1766_s9 }
  0x42   :  { %410 = vrot.lane.b32.xlu0 %v196_v20, %s1763_s29  ;;  %1569 = vrot.lane.b32.xlu1 %v1568_v21, %s1767_s10 }
  0x43   :  { %1574 = vrot.lane.b32.xlu2 %v1568_v21, %s1768_s11 }
  0x4a   :  { %1579 = vrot.lane.b32.xlu0 %v1568_v21, %s1769_s12  ;;  %354 = vrot.lane.b32.xlu1 %v196_v20, %s1762_s0 }
  0x4b   :  { %382 = vrot.lane.b32.xlu2 %v196_v20, %s1764_s30 }
  0x52   :  { %326 = vrot.lane.b32.xlu0 %v196_v20, %s1766_s9  ;;  %244 = vrot.lane.b32.xlu1 %v1836_v13, %s1767_s10 }
  0x53   :  { %272 = vrot.lane.b32.xlu2 %v1836_v13, %s1768_s11 }
  0x5a   :  { %216 = vrot.lane.b32.xlu0 %v1836_v13, %s1769_s12 }
  0x65   :  { %v1879_v22 = vpop.permute.xlu2 %1484 }
  0x66   :  { %v1486_v42 = vunpack.i.l.bf16 %v1879_v22 }
  0x6d   :  { %v1881_v23 = vpop.permute.xlu2 %1489 }
  0x6e   :  { %v1491_v43 = vunpack.i.l.bf16 %v1881_v23 }
  0x75   :  { %v1505_v35 = vpop.permute.xlu2 %1504 }
  0x76   :  { %v1506_v44 = vunpack.i.l.bf16 %v1505_v35  ;;  %v1507_v56 = vunpack.i.h.bf16 %v1505_v35  ;;  %v1487_v35 = vunpack.i.h.bf16 %v1879_v22 }
  0x78   :  { %v329_v0 = vsel %vm2554_vm4, %v1506_v44, %v1507_v56 }
  0x7c   :  { %v1475_v24 = vpop.permute.xlu1 %1474  ;;  %v1465_v25 = vpop.permute.xlu0 %1464 }
  0x7d   :  { %v1467_v26 = vunpack.i.h.bf16 %v1465_v25  ;;  %v1466_v27 = vunpack.i.l.bf16 %v1465_v25  ;;  %v1477_v31 = vunpack.i.h.bf16 %v1475_v24  ;;  %v1476_v32 = vunpack.i.l.bf16 %v1475_v24  ;;  %v1520_v52 = vpop.permute.xlu2 %1519 }
  0x7e   :  { %v1522_v14 = vunpack.i.h.bf16 %v1520_v52  ;;  %v1521_v17 = vunpack.i.l.bf16 %v1520_v52 }
  0x7f   :  { %v454_v28 = vpack.c.bf16 %v1466_v27, %v1466_v27  ;;  %v413_v29 = vsel %vm2558_vm0, %v1466_v27, %v1467_v26  ;;  %v357_v39 = vsel %vm2557_vm1, %v1476_v32, %v1477_v31  ;;  %v358_v51 = vsel %vm2557_vm1, %v1477_v31, %v1486_v42 }
  0x80   :  { %v455_v30 = vpack.c.bf16 %v413_v29, %v413_v29 }
  0x81   :  { %553 = vrot.lane.b32.xlu1 %v454_v28, %s1770_s13  ;;  %v247_v28 = vsel %vm2553_vm5, %v1521_v17, %v1522_v14 }
  0x82   :  { %555 = vrot.lane.b32.xlu2 %v455_v30, %s1770_s13 }
  0x84   :  { %v1480_v33 = vpop.permute.xlu1 %1479  ;;  %v1470_v34 = vpop.permute.xlu0 %1469 }
  0x85   :  { %v1482_v36 = vunpack.i.h.bf16 %v1480_v33  ;;  %v1481_v37 = vunpack.i.l.bf16 %v1480_v33  ;;  %v1472_v45 = vunpack.i.h.bf16 %v1470_v34  ;;  %v1471_v57 = vunpack.i.l.bf16 %v1470_v34  ;;  %v1918_v18 = vpop.permute.xlu2 %1534 }
  0x86   :  { %v1536_v19 = vunpack.i.l.bf16 %v1918_v18  ;;  %v1537_v29 = vunpack.i.h.bf16 %v1918_v18 }
  0x87   :  { %v447_v38 = vpack.c.bf16 %v1481_v37, %v1476_v32  ;;  %v385_v40 = vsel %vm2556_vm2, %v1481_v37, %v1482_v36  ;;  %v386_v48 = vsel %vm2556_vm2, %v1482_v36, %v1491_v43  ;;  %v414_v62 = vsel %vm2558_vm0, %v1467_v26, %v1471_v57 }
  0x88   :  { %v448_v41 = vpack.c.bf16 %v385_v40, %v357_v39  ;;  %v449_v54 = vpack.c.bf16 %v386_v48, %v358_v51  ;;  %v456_v5 = vpack.c.bf16 %v414_v62, %v414_v62  ;;  %v415_v20 = vsel %vm2558_vm0, %v1471_v57, %v1472_v45 }
  0x89   :  { %539 = vrot.lane.b32.xlu1 %v447_v38, %s1770_s13  ;;  %v457_v30 = vpack.c.bf16 %v415_v20, %v415_v20  ;;  %v1492_v36 = vunpack.i.h.bf16 %v1881_v23 }
  0x8a   :  { %541 = vrot.lane.b32.xlu2 %v448_v41, %s1770_s13 }
  0x8b   :  { %v387_v51 = vsel %vm2556_vm2, %v1491_v43, %v1492_v36 }
  0x8c   :  { %v1500_v46 = vpop.permute.xlu1 %1499  ;;  %v1892_v47 = vpop.permute.xlu0 %1494 }
  0x8d   :  { %v1501_v49 = vunpack.i.l.bf16 %v1500_v46  ;;  %v1496_v50 = vunpack.i.l.bf16 %v1892_v47  ;;  %v1502_v58 = vunpack.i.h.bf16 %v1500_v46  ;;  %v1550_v41 = vpop.permute.xlu2 %1549 }
  0x8f   :  { %v440_v53 = vpack.c.bf16 %v1506_v44, %v1501_v49  ;;  %v416_v55 = vsel %vm2558_vm0, %v1472_v45, %v1496_v50  ;;  %v301_v63 = vsel %vm2555_vm3, %v1501_v49, %v1502_v58  ;;  %v277_v45 = vsel %vm2552_vm6, %v1536_v19, %v1537_v29 }
  0x90   :  { %v458_v59 = vpack.c.bf16 %v416_v55, %v416_v55  ;;  %v441_v8 = vpack.c.bf16 %v329_v0, %v301_v63  ;;  %v359_v49 = vsel %vm2557_vm1, %v1486_v42, %v1487_v35  ;;  %v1552_v55 = vunpack.i.h.bf16 %v1550_v41 }
  0x91   :  { %525 = vrot.lane.b32.xlu0 %v440_v53, %s1770_s13  ;;  %543 = vrot.lane.b32.xlu1 %v449_v54, %s1770_s13  ;;  %v450_v57 = vpack.c.bf16 %v387_v51, %v359_v49 }
  0x92   :  { %561 = vrot.lane.b32.xlu2 %v458_v59, %s1770_s13 }
  0x94   :  { %v1907_v60 = vpop.permute.xlu1 %1514  ;;  %v1909_v61 = vpop.permute.xlu0 %1509 }
  0x95   :  { %v1516_v1 = vunpack.i.l.bf16 %v1907_v60  ;;  %v1511_v2 = vunpack.i.l.bf16 %v1909_v61  ;;  %v1517_v39 = vunpack.i.h.bf16 %v1907_v60  ;;  %v1512_v40 = vunpack.i.h.bf16 %v1909_v61 }
  0x97   :  { %v302_v9 = vsel %vm2555_vm3, %v1502_v58, %v1511_v2  ;;  %v330_v10 = vsel %vm2554_vm4, %v1507_v56, %v1516_v1  ;;  %v303_v52 = vsel %vm2555_vm3, %v1511_v2, %v1512_v40  ;;  %v331_v53 = vsel %vm2554_vm4, %v1516_v1, %v1517_v39  ;;  %v1976_v1 = vpop.permute.xlu2 %1564 }
  0x98   :  { %v442_v11 = vpack.c.bf16 %v330_v10, %v302_v9  ;;  %v1551_v56 = vunpack.i.l.bf16 %v1550_v41  ;;  %v443_v58 = vpack.c.bf16 %v331_v53, %v303_v52  ;;  %v1497_v10 = vunpack.i.h.bf16 %v1892_v47 }
  0x99   :  { %557 = vrot.lane.b32.xlu0 %v456_v5, %s1770_s13  ;;  %527 = vrot.lane.b32.xlu1 %v441_v8, %s1770_s13 }
  0x9a   :  { %529 = vrot.lane.b32.xlu2 %v442_v11, %s1770_s13  ;;  %v219_v23 = vsel %vm2551_vm7, %v1551_v56, %v1552_v55  ;;  %v417_v15 = vsel %vm2558_vm0, %v1496_v50, %v1497_v10  ;;  %v1566_v50 = vunpack.i.l.bf16 %v1976_v1 }
  0x9b   :  { %v426_v2 = vpack.c.bf16 %v219_v23, %v189_v16 }
  0x9c   :  { %v1925_v21 = vpop.permute.xlu0 %1524  ;;  %v1530_v24 = vpop.permute.xlu1 %1529 }
  0x9d   :  { %v1526_v25 = vunpack.i.l.bf16 %v1925_v21  ;;  %v1532_v26 = vunpack.i.h.bf16 %v1530_v24  ;;  %v1531_v27 = vunpack.i.l.bf16 %v1530_v24  ;;  %v1527_v31 = vunpack.i.h.bf16 %v1925_v21 }
  0x9e   :  { %v1567_v21 = vunpack.i.h.bf16 %v1976_v1 }
  0x9f   :  { %v248_v32 = vsel %vm2553_vm5, %v1522_v14, %v1526_v25  ;;  %v276_v33 = vsel %vm2552_vm6, %v1532_v26, %v1536_v19  ;;  %v275_v34 = vsel %vm2552_vm6, %v1531_v27, %v1532_v26  ;;  %v249_v44 = vsel %vm2553_vm5, %v1526_v25, %v1527_v31  ;;  %v1575_v19 = vpop.permute.xlu2 %1574 }
  0xa0   :  { %v434_v37 = vpack.c.bf16 %v276_v33, %v248_v32  ;;  %v433_v38 = vpack.c.bf16 %v275_v34, %v247_v28  ;;  %v435_v54 = vpack.c.bf16 %v277_v45, %v249_v44  ;;  %v1577_v25 = vunpack.i.h.bf16 %v1575_v19 }
  0xa1   :  { %559 = vrot.lane.b32.xlu0 %v457_v30, %s1770_s13  ;;  %v459_v27 = vpack.c.bf16 %v417_v15, %v417_v15  ;;  %v1576_v34 = vunpack.i.l.bf16 %v1575_v19  ;;  %v332_v45 = vsel %vm2554_vm4, %v1517_v39, %v1566_v50 }
  0xa2   :  { %513 = vrot.lane.b32.xlu2 %v434_v37, %s1770_s13  ;;  %511 = vrot.lane.b32.xlu1 %v433_v38, %s1770_s13 }
  0xa4   :  { %v1947_v46 = vpop.permute.xlu0 %1539  ;;  %v1949_v48 = vpop.permute.xlu1 %1544 }
  0xa5   :  { %v1541_v22 = vunpack.i.l.bf16 %v1947_v46  ;;  %v1546_v42 = vunpack.i.l.bf16 %v1949_v48  ;;  %v1542_v32 = vunpack.i.h.bf16 %v1947_v46  ;;  %v1547_v33 = vunpack.i.h.bf16 %v1949_v48 }
  0xa7   :  { %v360_v62 = vsel %vm2557_vm1, %v1487_v35, %v1541_v22  ;;  %v388_v63 = vsel %vm2556_vm2, %v1492_v36, %v1546_v42  ;;  %v279_v36 = vsel %vm2552_vm6, %v1576_v34, %v1577_v25  ;;  %v361_v38 = vsel %vm2557_vm1, %v1541_v22, %v1542_v32  ;;  %v383_v61 = vpop.permute.xlu2 %382 }
  0xa8   :  { %v451_v8 = vpack.c.bf16 %v388_v63, %v360_v62  ;;  %v389_v41 = vsel %vm2556_vm2, %v1546_v42, %v1547_v33  ;;  %v390_v56 = vsel %vm2556_vm2, %v1547_v33, %v383_v61 }
  0xa9   :  { %545 = vrot.lane.b32.xlu0 %v450_v57, %s1770_s13  ;;  %v452_v52 = vpack.c.bf16 %v389_v41, %v361_v38 }
  0xaa   :  { %531 = vrot.lane.b32.xlu2 %v443_v58, %s1770_s13  ;;  %515 = vrot.lane.b32.xlu1 %v435_v54, %s1770_s13  ;;  %v278_v54 = vsel %vm2552_vm6, %v1537_v29, %v1576_v34 }
  0xac   :  { %v1969_v43 = vpop.permute.xlu0 %1554  ;;  %v1971_v59 = vpop.permute.xlu1 %1559 }
  0xad   :  { %v1556_v0 = vunpack.i.l.bf16 %v1969_v43  ;;  %v1557_v5 = vunpack.i.h.bf16 %v1969_v43  ;;  %v1561_v28 = vunpack.i.l.bf16 %v1971_v59  ;;  %v1562_v62 = vunpack.i.h.bf16 %v1971_v59 }
  0xaf   :  { %v220_v9 = vsel %vm2551_vm7, %v1552_v55, %v1556_v0  ;;  %v221_v14 = vsel %vm2551_vm7, %v1556_v0, %v1557_v5  ;;  %v304_v37 = vsel %vm2555_vm3, %v1512_v40, %v1561_v28  ;;  %v273_v23 = vpop.permute.xlu2 %272  ;;  %v305_v1 = vsel %vm2555_vm3, %v1561_v28, %v1562_v62 }
  0xb0   :  { %v427_v11 = vpack.c.bf16 %v220_v9, %v1817_v3  ;;  %v428_v24 = vpack.c.bf16 %v221_v14, %v1819_v4  ;;  %v444_v49 = vpack.c.bf16 %v332_v45, %v304_v37  ;;  %v280_v43 = vsel %vm2552_vm6, %v1577_v25, %v273_v23 }
  0xb1   :  { %547 = vrot.lane.b32.xlu0 %v451_v8, %s1770_s13 }
  0xb2   :  { %499 = vrot.lane.b32.xlu2 %v427_v11, %s1770_s13  ;;  %497 = vrot.lane.b32.xlu1 %v426_v2, %s1770_s13 }
  0xb4   :  { %v411_v17 = vpop.permute.xlu0 %410  ;;  %v1570_v20 = vpop.permute.xlu1 %1569 }
  0xb5   :  { %v418_v16 = vsel %vm2558_vm0, %v1497_v10, %v411_v17  ;;  %v1572_v26 = vunpack.i.h.bf16 %v1570_v20  ;;  %v1571_v47 = vunpack.i.l.bf16 %v1570_v20 }
  0xb6   :  { %v460_v30 = vpack.c.bf16 %v418_v16, %v418_v16 }
  0xb7   :  { %v251_v35 = vsel %vm2553_vm5, %v1571_v47, %v1572_v26  ;;  %v250_v60 = vsel %vm2553_vm5, %v1527_v31, %v1571_v47 }
  0xb8   :  { %v437_v46 = vpack.c.bf16 %v279_v36, %v251_v35  ;;  %v436_v57 = vpack.c.bf16 %v278_v54, %v250_v60 }
  0xb9   :  { %563 = vrot.lane.b32.xlu0 %v459_v27, %s1770_s13 }
  0xba   :  { %501 = vrot.lane.b32.xlu2 %v428_v24, %s1770_s13  ;;  %565 = vrot.lane.b32.xlu1 %v460_v30, %s1770_s13 }
  0xbc   :  { %v1580_v44 = vpop.permute.xlu0 %1579  ;;  %v355_v51 = vpop.permute.xlu1 %354 }
  0xbd   :  { %v1582_v48 = vunpack.i.h.bf16 %v1580_v44  ;;  %v1581_v53 = vunpack.i.l.bf16 %v1580_v44  ;;  %v362_v39 = vsel %vm2557_vm1, %v1542_v32, %v355_v51 }
  0xbe   :  { %v453_v22 = vpack.c.bf16 %v390_v56, %v362_v39 }
  0xbf   :  { %v223_v40 = vsel %vm2551_vm7, %v1581_v53, %v1582_v48  ;;  %v222_v18 = vsel %vm2551_vm7, %v1557_v5, %v1581_v53  ;;  %v333_v5 = vsel %vm2554_vm4, %v1566_v50, %v1567_v21 }
  0xc0   :  { %v430_v55 = vpack.c.bf16 %v223_v40, %v1823_v7  ;;  %v429_v63 = vpack.c.bf16 %v222_v18, %v1821_v6  ;;  %v445_v59 = vpack.c.bf16 %v333_v5, %v305_v1 }
  0xc1   :  { %533 = vrot.lane.b32.xlu0 %v444_v49, %s1770_s13 }
  0xc2   :  { %549 = vrot.lane.b32.xlu2 %v452_v52, %s1770_s13  ;;  %519 = vrot.lane.b32.xlu1 %v437_v46, %s1770_s13 }
  0xc4   :  { %v327_v42 = vpop.permute.xlu0 %326  ;;  %v245_v58 = vpop.permute.xlu1 %244 }
  0xc5   :  { %v334_v29 = vsel %vm2554_vm4, %v1567_v21, %v327_v42  ;;  %v252_v31 = vsel %vm2553_vm5, %v1572_v26, %v245_v58  ;;  %v439_v17 = vpack.c.bf16 %v273_v23, %v245_v58  ;;  %v461_v42 = vld [vmem:[%s2541_s1] sm:$0xf] }
  0xc6   :  { %v446_v0 = vpack.c.bf16 %v334_v29, %v1562_v62  ;;  %v438_v2 = vpack.c.bf16 %v280_v43, %v252_v31 }
  0xc9   :  { %517 = vrot.lane.b32.xlu0 %v436_v57, %s1770_s13 }
  0xca   :  { %505 = vrot.lane.b32.xlu2 %v430_v55, %s1770_s13  ;;  %551 = vrot.lane.b32.xlu1 %v453_v22, %s1770_s13 }
  0xcc   :  { %v217_v8 = vpop.permute.xlu0 %216 }
  0xcd   :  { %v224_v9 = vsel %vm2551_vm7, %v1582_v48, %v217_v8  ;;  %v432_v10 = vpack.c.bf16 %v217_v8, %v1836_v13 }
  0xce   :  { %v431_v11 = vpack.c.bf16 %v224_v9, %v1834_v12 }
  0xd1   :  { %503 = vrot.lane.b32.xlu0 %v429_v63, %s1770_s13 }
  0xd2   :  { %521 = vrot.lane.b32.xlu2 %v438_v2, %s1770_s13  ;;  %537 = vrot.lane.b32.xlu1 %v446_v0, %s1770_s13 }
  0xd9   :  { %535 = vrot.lane.b32.xlu0 %v445_v59, %s1770_s13 }
  0xda   :  { %507 = vrot.lane.b32.xlu1 %v431_v11, %s1770_s13  ;;  %509 = vrot.lane.b32.xlu2 %v432_v10, %s1770_s13  ;;  %v1771_v11 = vmov 0.0  }
  0xdc   :  { %v556_v14 = vpop.permute.xlu2 %555 }
  0xe1   :  { %523 = vrot.lane.b32.xlu0 %v439_v17, %s1770_s13 }
  0xe4   :  { %v542_v15 = vpop.permute.xlu2 %541 }
  0xe9   :  { %1017 = vrot.lane.b32.xlu0 %v1771_v11, %s1763_s29 }
  0xec   :  { %v562_v16 = vpop.permute.xlu2 %561 }
  0xf1   :  { %963 = vrot.lane.b32.xlu0 %v1771_v11, %s1762_s0 }
  0xf3   :  { %v554_v19 = vpop.permute.xlu1 %553 }
  0xf4   :  { %v592_v20 = vsel %vm2550_vm8, %v554_v19, %v556_v14  ;;  %v530_v25 = vpop.permute.xlu2 %529 }
  0xf5   :  { %v628_v24 = vsel %vm2549_vm9, %v592_v20, 0 }
  0xf6   :  { %648 = vmatpush.bf16.msra.mxu0 %v628_v24 }
  0xfb   :  { %v540_v26 = vpop.permute.xlu1 %539 }
  0xfc   :  { %v586_v27 = vsel %vm2550_vm8, %v540_v26, %v542_v15  ;;  %v514_v28 = vpop.permute.xlu2 %513 }
  0xfd   :  { %649 = vmatpush.bf16.msra.mxu0 %v586_v27 }
 0x103   :  { %v526_v30 = vpop.permute.xlu0 %525  ;;  %v544_v32 = vpop.permute.xlu1 %543 }
 0x104   :  { %v532_v33 = vpop.permute.xlu2 %531  ;;  %v587_v37 = vsel %vm2550_vm8, %v542_v15, %v544_v32 }
 0x105   :  { %v582_v54 = vsel %vm2550_vm8, %v530_v25, %v532_v33 }
 0x10b   :  { %v558_v34 = vpop.permute.xlu0 %557  ;;  %v528_v47 = vpop.permute.xlu1 %527 }
 0x10c   :  { %v580_v50 = vsel %vm2550_vm8, %v526_v30, %v528_v47  ;;  %v593_v35 = vsel %vm2550_vm8, %v556_v14, %v558_v34  ;;  %v500_v41 = vpop.permute.xlu2 %499  ;;  %v581_v49 = vsel %vm2550_vm8, %v528_v47, %v530_v25 }
 0x10d   :  { %650 = vmatpush.bf16.msra.mxu0 %v580_v50  ;;  %v631_v36 = vsel %vm2549_vm9, %v593_v35, 0  ;;  %v42_v50 = vlaneseq }
 0x10e   :  { %661 = vmatpush.bf16.msra.mxu1 %v631_v36 }
 0x10f   :  { %v43_v35 = vand.u32 127, %v42_v50 }
 0x111   :  { %v2094_v36 = vcvt.s32.f32 %v43_v35 }
 0x112   :  { %662 = vmatpush.bf16.msra.mxu1 %v587_v37  ;;  %v44_v37 = vadd.s32 128, %v43_v35 }
 0x113   :  { %v560_v38 = vpop.permute.xlu0 %559  ;;  %vm157_vm2 = vcmp.lt.f32.partialorder %v2094_v36, 648.0 }
 0x114   :  { %v512_v44 = vpop.permute.xlu1 %511  ;;  %v594_v45 = vsel %vm2550_vm8, %v558_v34, %v560_v38  ;;  %v595_v46 = vsel %vm2550_vm8, %v560_v38, %v562_v16  ;;  %v502_v39 = vpop.permute.xlu2 %501  ;;  %v55_v38 = vadd.f32 0.5, %v2094_v36 }
 0x115   :  { %v574_v48 = vsel %vm2550_vm8, %v512_v44, %v514_v28  ;;  %v634_v51 = vsel %vm2549_vm9, %v594_v45, 0  ;;  %v637_v52 = vsel %vm2549_vm9, %v595_v46, 0  ;;  %v569_v55 = vsel %vm2550_vm8, %v500_v41, %v502_v39 }
 0x116   :  { %651 = vmatpush.bf16.msra.mxu0 %v574_v48  ;;  %663 = vmatpush.bf16.msra.mxu1 %v581_v49  ;;  %v45_v44 = vadd.s32 256, %v43_v35  ;;  %v61_v45 = vmul.f32 0.0030864198, %v55_v38  ;;  %v46_v49 = vadd.s32 384, %v43_v35 }
 0x117   :  { %674 = vmatpush.bf16.msra.mxu2 %v634_v51  ;;  %687 = vmatpush.bf16.msra.mxu3 %v637_v52 }
 0x118   :  { %v2100_v48 = vcvt.s32.f32 %v45_v44  ;;  %v67_v51 = vfloor.f32 %v61_v45 }
 0x11b   :  { %v546_v53 = vpop.permute.xlu0 %545 }
 0x11c   :  { %v516_v61 = vpop.permute.xlu1 %515  ;;  %v588_v40 = vsel %vm2550_vm8, %v544_v32, %v546_v53  ;;  %v550_v62 = vpop.permute.xlu2 %549 }
 0x11d   :  { %675 = vmatpush.bf16.msra.mxu2 %v588_v40  ;;  %v575_v60 = vsel %vm2550_vm8, %v514_v28, %v516_v61  ;;  %v73_v40 = vmul.f32 324.0, %v67_v51 }
 0x11e   :  { %664 = vmatpush.bf16.msra.mxu1 %v575_v60 }
 0x121   :  { %676 = vmatpush.bf16.msra.mxu2 %v582_v54 }
 0x122   :  { %665 = vmatpush.bf16.msra.mxu1 %v569_v55 }
 0x123   :  { %v548_v56 = vpop.permute.xlu0 %547 }
 0x124   :  { %v498_v57 = vpop.permute.xlu1 %497  ;;  %v589_v22 = vsel %vm2550_vm8, %v546_v53, %v548_v56  ;;  %v590_v63 = vsel %vm2550_vm8, %v548_v56, %v550_v62  ;;  %v506_v14 = vpop.permute.xlu2 %505  ;;  %v57_v53 = vadd.f32 0.5, %v2100_v48 }
 0x125   :  { %688 = vmatpush.bf16.msra.mxu3 %v589_v22  ;;  %v568_v58 = vsel %vm2550_vm8, %v498_v57, %v500_v41  ;;  %1439 = vmatmul.msk.bf16.vlgmr.msra.gmra.mxu1 %vm2548_vm10, %v461_v42  ;;  %v2097_v41 = vcvt.s32.f32 %v44_v37  ;;  %v79_v57 = vsub.f32 %v2094_v36, %v73_v40  ;;  %v776_v36 = vld [vmem:[%s2543_s3] sm:$0xff] }
 0x126   :  { %652 = vmatpush.bf16.msra.mxu0 %v568_v58  ;;  %v63_v54 = vmul.f32 0.0030864198, %v57_v53 }
 0x127   :  { %v56_v46 = vadd.f32 0.5, %v2097_v41 }
 0x128   :  { %v69_v58 = vfloor.f32 %v63_v54 }
 0x129   :  { %1438 = vmatmul.msk.bf16.vlgmr.msra.gmra.mxu0 %vm2548_vm10, %v461_v42  ;;  %v62_v52 = vmul.f32 0.0030864198, %v56_v46 }
 0x12b   :  { %v564_v23 = vpop.permute.xlu0 %563  ;;  %v68_v60 = vfloor.f32 %v62_v52 }
 0x12c   :  { %v566_v21 = vpop.permute.xlu1 %565  ;;  %v596_v18 = vsel %vm2550_vm8, %v562_v16, %v564_v23  ;;  %v522_v26 = vpop.permute.xlu2 %521 }
 0x12d   :  { %v640_v29 = vsel %vm2549_vm9, %v596_v18, 0  ;;  %v597_v31 = vsel %vm2550_vm8, %v564_v23, %v566_v21  ;;  %v74_v22 = vmul.f32 324.0, %v68_v60 }
 0x12e   :  { %700 = vmatpush.bf16.msrb.mxu0 %v640_v29  ;;  %v643_v43 = vsel %vm2549_vm9, %v597_v31, 0  ;;  %v85_v29 = vadd.f32 0.5, %v79_v57 }
 0x12f   :  { %713 = vmatpush.bf16.msrb.mxu1 %v643_v43  ;;  %v80_v31 = vsub.f32 %v2097_v41, %v74_v22  ;;  %v2559_v22 = vmov 0 }
 0x132   :  { %701 = vmatpush.bf16.msrb.mxu0 %v590_v63 }
 0x133   :  { %v534_v0 = vpop.permute.xlu0 %533 }
 0x134   :  { %v520_v2 = vpop.permute.xlu1 %519  ;;  %v583_v8 = vsel %vm2550_vm8, %v532_v33, %v534_v0  ;;  %v510_v34 = vpop.permute.xlu2 %509 }
 0x135   :  { %689 = vmatpush.bf16.msra.mxu3 %v583_v8  ;;  %v578_v27 = vsel %vm2550_vm8, %v520_v2, %v522_v26  ;;  %v91_v8 = vmul.f32 0.055555556, %v85_v29 }
 0x13b   :  { %v518_v1 = vpop.permute.xlu0 %517 }
 0x13c   :  { %v552_v5 = vpop.permute.xlu1 %551  ;;  %v576_v9 = vsel %vm2550_vm8, %v516_v61, %v518_v1  ;;  %v577_v10 = vsel %vm2550_vm8, %v518_v1, %v520_v2  ;;  %v2103_v61 = vcvt.s32.f32 %v46_v49 }
 0x13d   :  { %677 = vmatpush.bf16.msra.mxu2 %v576_v9  ;;  %690 = vmatpush.bf16.msra.mxu3 %v577_v10  ;;  %v591_v59 = vsel %vm2550_vm8, %v550_v62, %v552_v5  ;;  %v75_v62 = vmul.f32 324.0, %v69_v58  ;;  %v86_v5 = vadd.f32 0.5, %v80_v31 }
 0x13e   :  { %714 = vmatpush.bf16.msrb.mxu1 %v591_v59  ;;  %v58_v55 = vadd.f32 0.5, %v2103_v61 }
 0x13f   :  { %v81_v9 = vsub.f32 %v2100_v48, %v75_v62 }
 0x140   :  { %v64_v23 = vmul.f32 0.0030864198, %v58_v55 }
 0x142   :  { %v70_v63 = vfloor.f32 %v64_v23 }
 0x143   :  { %v504_v17 = vpop.permute.xlu0 %503 }
 0x144   :  { %v570_v15 = vsel %vm2550_vm8, %v502_v39, %v504_v17  ;;  %v571_v16 = vsel %vm2550_vm8, %v504_v17, %v506_v14  ;;  %v538_v19 = vpop.permute.xlu1 %537  ;;  %v47_v39 = vadd.s32 512, %v43_v35  ;;  %v76_v10 = vmul.f32 324.0, %v70_v63 }
 0x145   :  { %678 = vmatpush.bf16.msra.mxu2 %v570_v15  ;;  %691 = vmatpush.bf16.msra.mxu3 %v571_v16  ;;  %v97_v17 = vfloor.f32 %v91_v8  ;;  %v92_v15 = vmul.f32 0.055555556, %v86_v5 }
 0x146   :  { %v2106_v56 = vcvt.s32.f32 %v47_v39 }
 0x147   :  { %vm115_vm11 = vcmp.ge.f32.partialorder %v97_v17, 1.0  ;;  %vm121_vm12 = vcmp.le.f32.partialorder %v97_v17, 16.0 }
 0x148   :  { %1440 = vmatmul.msk.bf16.vlgmr.msra.gmra.mxu2 %vm2548_vm10, %v461_v42  ;;  %1441 = vmatmul.msk.bf16.vlgmr.msra.gmra.mxu3 %vm2548_vm10, %v461_v42  ;;  %v59_v21 = vadd.f32 0.5, %v2106_v56  ;;  %vm127_vm14 = vmand %vm115_vm11, %vm121_vm12 }
 0x14b   :  { %v536_v20 = vpop.permute.xlu0 %535 }
 0x14c   :  { %v584_v24 = vsel %vm2550_vm8, %v534_v0, %v536_v20  ;;  %v585_v25 = vsel %vm2550_vm8, %v536_v20, %v538_v19  ;;  %v508_v28 = vpop.permute.xlu1 %507  ;;  %v65_v0 = vmul.f32 0.0030864198, %v59_v21  ;;  %v87_v19 = vadd.f32 0.5, %v81_v9  ;;  %v788_v21 = vld [vmem:[%s2544_s4] sm:$0xff] }
 0x14d   :  { %702 = vmatpush.bf16.msrb.mxu0 %v584_v24  ;;  %715 = vmatpush.bf16.msrb.mxu1 %v585_v25  ;;  %v572_v32 = vsel %vm2550_vm8, %v506_v14, %v508_v28  ;;  %v573_v47 = vsel %vm2550_vm8, %v508_v28, %v510_v34  ;;  %v82_v20 = vsub.f32 %v2103_v61, %v76_v10 }
 0x14e   :  { %v71_v59 = vfloor.f32 %v65_v0 }
 0x150   :  { %v77_v24 = vmul.f32 324.0, %v71_v59 }
 0x151   :  { %703 = vmatpush.bf16.msrb.mxu0 %v578_v27  ;;  %v98_v27 = vfloor.f32 %v92_v15 }
 0x153   :  { %v524_v30 = vpop.permute.xlu0 %523  ;;  %v104_v50 = vmul.f32 18.0, %v98_v27  ;;  %vm116_vm15 = vcmp.ge.f32.partialorder %v98_v27, 1.0 }
 0x154   :  { %v579_v33 = vsel %vm2550_vm8, %v522_v26, %v524_v30  ;;  %v103_v26 = vmul.f32 18.0, %v97_v17  ;;  %v93_v30 = vmul.f32 0.055555556, %v87_v19 }
 0x155   :  { %704 = vmatpush.bf16.msrb.mxu0 %v572_v32  ;;  %716 = vmatpush.bf16.msrb.mxu1 %v579_v33  ;;  %v88_v32 = vadd.f32 0.5, %v82_v20  ;;  %v83_v33 = vsub.f32 %v2106_v56, %v77_v24  ;;  %v110_v45 = vsub.f32 %v80_v31, %v104_v50 }
 0x157   :  { %v94_v37 = vmul.f32 0.055555556, %v88_v32  ;;  %v89_v38 = vadd.f32 0.5, %v83_v33  ;;  %vm134_vm7 = vcmp.ge.f32.partialorder %v110_v45, 1.0  ;;  %vm146_vm12 = vcmp.le.f32.partialorder %v110_v45, 16.0 }
 0x158   :  { %1442 = vmatmul.msk.bf16.vlgmr.msrb.gmra.mxu0 %vm2548_vm10, %v461_v42 }
 0x159   :  { %717 = vmatpush.bf16.msrb.mxu1 %v573_v47  ;;  %v109_v47 = vsub.f32 %v79_v57, %v103_v26  ;;  %v100_v49 = vfloor.f32 %v94_v37  ;;  %v95_v51 = vmul.f32 0.055555556, %v89_v38 }
 0x15b   :  { %vm133_vm13 = vcmp.ge.f32.partialorder %v109_v47, 1.0  ;;  %vm145_vm8 = vcmp.le.f32.partialorder %v109_v47, 16.0  ;;  %v106_v40 = vmul.f32 18.0, %v100_v49  ;;  %v101_v60 = vfloor.f32 %v95_v51  ;;  %v2188_v45 = vpop.permute.xlu0 %1017 }
 0x15c   :  { %1443 = vmatmul.msk.bf16.vlgmr.msrb.gmra.mxu1 %vm2548_vm10, %v461_v42  ;;  %v48_v42 = vadd.s32 640, %v43_v35  ;;  %v99_v35 = vfloor.f32 %v93_v30  ;;  %vm122_vm10 = vcmp.le.f32.partialorder %v98_v27, 16.0  ;;  %vm139_vm9 = vmand %vm127_vm14, %vm133_vm13  ;;  %vm124_vm14 = vcmp.le.f32.partialorder %v100_v49, 16.0 }
 0x15d   :  { %vm128_vm6 = vmand %vm116_vm15, %vm122_vm10  ;;  %v112_v54 = vsub.f32 %v82_v20, %v106_v40  ;;  %v107_v55 = vmul.f32 18.0, %v101_v60  ;;  %vm118_vm10 = vcmp.ge.f32.partialorder %v100_v49, 1.0 }
 0x15e   :  { %v2110_v18 = vcvt.s32.f32 %v48_v42  ;;  %v105_v46 = vmul.f32 18.0, %v99_v35  ;;  %vm117_vm5 = vcmp.ge.f32.partialorder %v99_v35, 1.0  ;;  %vm123_vm4 = vcmp.le.f32.partialorder %v99_v35, 16.0  ;;  %vm151_vm3 = vmand %vm139_vm9, %vm145_vm8 }
 0x15f   :  { %vm140_vm11 = vmand %vm128_vm6, %vm134_vm7  ;;  %vm158_vm8 = vcmp.lt.f32.partialorder %v2097_v41, 648.0  ;;  %v1772_v42 = vmov 0   ;;  %v113_v58 = vsub.f32 %v83_v33, %v107_v55  ;;  %vm125_vm9 = vcmp.le.f32.partialorder %v101_v60, 16.0 }
 0x160   :  { %v60_v2 = vadd.f32 0.5, %v2110_v18  ;;  %v111_v53 = vsub.f32 %v81_v9, %v105_v46  ;;  %vm129_vm1 = vmand %vm117_vm5, %vm123_vm4  ;;  %1583 = vset.pattern.permute.xlu2 %v1772_v42  ;;  %1704 = vset.pattern.permute.xlu0 %v1772_v42  ;;  %vm136_vm5 = vcmp.ge.f32.partialorder %v112_v54, 1.0 }
 0x161   :  { %vm2123_vm13 = vmand %vm151_vm3, %vm157_vm2  ;;  %779 = vperm.xlu2 %1583, %v776_v36   ;;  %vm119_vm3 = vcmp.ge.f32.partialorder %v101_v60, 1.0 }
 0x162   :  { %v66_v14 = vmul.f32 0.0030864198, %v60_v2  ;;  %vm135_vm0 = vcmp.ge.f32.partialorder %v111_v53, 1.0  ;;  %v2560_v22 = vsel %vm2123_vm13, 4294967295, %v2559_v22  ;;  %vm152_vm15 = vmand %vm140_vm11, %vm146_vm12  ;;  %vm147_vm7 = vcmp.le.f32.partialorder %v111_v53, 16.0 }
 0x163   :  { %vm141_vm6 = vmand %vm129_vm1, %vm135_vm0  ;;  %vm159_vm12 = vcmp.lt.f32.partialorder %v2100_v48, 648.0  ;;  %vm148_vm0 = vcmp.le.f32.partialorder %v112_v54, 16.0  ;;  %v2190_v46 = vpop.permute.xlu0 %963 }
 0x164   :  { %v72_v25 = vfloor.f32 %v66_v14  ;;  %vm130_vm4 = vmand %vm118_vm10, %vm124_vm14  ;;  %vm137_vm10 = vcmp.ge.f32.partialorder %v113_v58, 1.0 }
 0x165   :  { %vm164_vm2 = vmand %vm152_vm15, %vm158_vm8 }
 0x166   :  { %v78_v34 = vmul.f32 324.0, %v72_v25  ;;  %vm153_vm11 = vmand %vm141_vm6, %vm147_vm7  ;;  %vm2561_vm6 = vnez %v2560_v22  ;;  %v2141_v31 = vsel %vm164_vm2, 1.0, %v1771_v11 }
 0x167   :  { %vm142_vm13 = vmand %vm130_vm4, %vm136_vm5  ;;  %v2138_v29 = vsel %vm2561_vm6, 1.0, %v1771_v11  ;;  %vm160_vm4 = vcmp.lt.f32.partialorder %v2103_v61, 648.0 }
 0x168   :  { %v84_v44 = vsub.f32 %v2110_v18, %v78_v34  ;;  %vm131_vm1 = vmand %vm119_vm3, %vm125_vm9  ;;  %vm149_vm3 = vcmp.le.f32.partialorder %v113_v58, 16.0 }
 0x169   :  { %vm165_vm14 = vmand %vm153_vm11, %vm159_vm12  ;;  %791 = vperm.xlu2 %1583, %v788_v21   ;;  %vm161_vm12 = vcmp.lt.f32.partialorder %v2106_v56, 648.0 }
 0x16a   :  { %v90_v52 = vadd.f32 0.5, %v84_v44  ;;  %vm154_vm7 = vmand %vm142_vm13, %vm148_vm0  ;;  %v2145_v48 = vsel %vm165_vm14, 1.0, %v1771_v11 }
 0x16b   :  { %vm143_vm5 = vmand %vm131_vm1, %vm137_vm10 }
 0x16c   :  { %v96_v39 = vmul.f32 0.055555556, %v90_v52  ;;  %vm166_vm13 = vmand %vm154_vm7, %vm160_vm4 }
 0x16d   :  { %vm155_vm2 = vmand %vm143_vm5, %vm149_vm3  ;;  %v2159_v8 = vsel %vm166_vm13, 1.0, %v1771_v11  ;;  %vm2562_vm5 = vcmask 736256  }
 0x16e   :  { %v102_v57 = vfloor.f32 %v96_v39  ;;  %vm167_vm10 = vmand %vm155_vm2, %vm161_vm12  ;;  %vm2568_vm12 = vcmask 744448  }
 0x16f   :  { %v2168_v15 = vsel %vm167_vm10, 1.0, %v1771_v11  ;;  %vm2563_vm3 = vmmov %vm2562_vm5  ;;  %vm2571_vm10 = vcmask 891904  }
 0x170   :  { %v108_v23 = vmul.f32 18.0, %v102_v57  ;;  %vm120_vm8 = vcmp.ge.f32.partialorder %v102_v57, 1.0  ;;  %vm126_vm15 = vcmp.le.f32.partialorder %v102_v57, 16.0 }
 0x171   :  { %vm132_vm9 = vmand %vm120_vm8, %vm126_vm15  ;;  %vm162_vm8 = vcmp.lt.f32.partialorder %v2110_v18, 648.0  ;;  %990 = vrot.lane.b32.xlu2 %v1771_v11, %s1764_s30 }
 0x172   :  { %v114_v41 = vsub.f32 %v84_v44, %v108_v23 }
 0x174   :  { %vm138_vm11 = vcmp.ge.f32.partialorder %v114_v41, 1.0  ;;  %vm150_vm1 = vcmp.le.f32.partialorder %v114_v41, 16.0 }
 0x175   :  { %vm144_vm0 = vmand %vm132_vm9, %vm138_vm11  ;;  %vm2565_vm11 = vcmask 752640  }
 0x176   :  { %vm156_vm14 = vmand %vm144_vm0, %vm150_vm1 }
 0x177   :  { %vm168_vm15 = vmand %vm156_vm14, %vm162_vm8  ;;  %vm2572_vm14 = vcmask 883712  }
 0x178   :  { %v2178_v26 = vsel %vm168_vm15, 1.0, %v1771_v11  ;;  %vm2564_vm9 = vmmov %vm2563_vm3 }
 0x179   :  { %936 = vrot.lane.b32.xlu2 %v1771_v11, %s1766_s9  ;;  %vm2566_vm13 = vmmov %vm2565_vm11 }
 0x17a   :  { %vm2567_vm2 = vmmov %vm2565_vm11 }
 0x17b   :  { %vm2569_vm0 = vmmov %vm2568_vm12 }
 0x17c   :  { %vm2570_vm1 = vmmov %vm2569_vm0 }
 0x17d   :  { %vm2573_vm8 = vmmov %vm2571_vm10 }
 0x17e   :  { %vm2574_vm15 = vmmov %vm2572_vm14 }
 0x1a2   :  { %v2113_v43 = vpop.f32.mrf.mxu1 }
 0x1a3   :  { %v724_v2 = vmul.f32 %v2141_v31, %v2113_v43 }
 0x1a5   :  { %v737_v9 = vmul.f32 %v724_v2, %v2113_v43 }
 0x1a6   :  { %v2116_v1 = vpop.f32.mrf.mxu0 }
 0x1a7   :  { %v723_v0 = vmul.f32 %v2138_v29, %v2116_v1 }
 0x1a9   :  { %v736_v5 = vmul.f32 %v723_v0, %v2116_v1  ;;  %v729_v10 = vadd.f32 %v724_v2, %v723_v0 }
 0x1aa   :  { %v669_v16 = vpop.f32.mrf.mxu1 }
 0x1ab   :  { %v742_v16 = vadd.f32 %v737_v9, %v736_v5 }
 0x1ae   :  { %v656_v28 = vpop.f32.mrf.mxu0 }
 0x1bb   :  { %v780_v36 = vpop.permute.xlu2 %779 }
 0x1cb   :  { %v2147_v62 = vpop.f32.mrf.mxu2  ;;  %v2149_v63 = vpop.f32.mrf.mxu3 }
 0x1cc   :  { %v725_v61 = vmul.f32 %v2145_v48, %v2147_v62  ;;  %v726_v56 = vmul.f32 %v2159_v8, %v2149_v63 }
 0x1ce   :  { %v738_v59 = vmul.f32 %v725_v61, %v2147_v62  ;;  %v730_v19 = vadd.f32 %v729_v10, %v725_v61  ;;  %v739_v24 = vmul.f32 %v726_v56, %v2149_v63 }
 0x1d0   :  { %v743_v18 = vadd.f32 %v742_v16, %v738_v59  ;;  %v731_v28 = vadd.f32 %v730_v19, %v726_v56  ;;  %v792_v16 = vpop.permute.xlu2 %791 }
 0x1d2   :  { %v744_v34 = vadd.f32 %v743_v18, %v739_v24 }
 0x1d3   :  { %v682_v14 = vpop.f32.mrf.mxu2  ;;  %v695_v17 = vpop.f32.mrf.mxu3 }
 0x1d5   :  { %v2172_v20 = vpop.f32.mrf.mxu0 }
 0x1d6   :  { %v727_v25 = vmul.f32 %v2168_v15, %v2172_v20 }
 0x1d8   :  { %v740_v27 = vmul.f32 %v727_v25, %v2172_v20  ;;  %v732_v33 = vadd.f32 %v731_v28, %v727_v25 }
 0x1d9   :  { %v2181_v30 = vpop.f32.mrf.mxu1 }
 0x1da   :  { %v728_v32 = vmul.f32 %v2178_v26, %v2181_v30  ;;  %v745_v35 = vadd.f32 %v744_v34, %v740_v27 }
 0x1dc   :  { %v733_v47 = vadd.f32 %v732_v33, %v728_v32  ;;  %v741_v50 = vmul.f32 %v728_v32, %v2181_v30 }
 0x1dd   :  { %v708_v37 = vpop.f32.mrf.mxu0 }
 0x1de   :  { %734 = vadd.xlane.f32.xlu0 %v733_v47  ;;  %v746_v38 = vadd.f32 %v745_v35, %v741_v50 }
 0x1e0   :  { %747 = vadd.xlane.f32.xlu1 %v746_v38 }
 0x1e1   :  { %v721_v44 = vpop.f32.mrf.mxu1 }
 0x251   :  { %v735_v49 = vpop.xlane.xlu0 %734 }
 0x252   :  { %v749_v51 = vmul.f32 0.001953125, %v735_v49 }
 0x253   :  { %v748_v52 = vpop.xlane.xlu1 %747 }
 0x254   :  { %v750_v53 = vmul.f32 0.001953125, %v748_v52  ;;  %v751_v40 = vmul.f32 %v749_v51, %v749_v51  ;;  %v753_v23 = vsub.f32 %v2116_v1, %v749_v51  ;;  %v754_v41 = vsub.f32 %v2113_v43, %v749_v51 }
 0x255   :  { %v755_v21 = vsub.f32 %v2147_v62, %v749_v51  ;;  %v756_v0 = vsub.f32 %v2149_v63, %v749_v51  ;;  %v757_v50 = vsub.f32 %v2172_v20, %v749_v51  ;;  %v758_v35 = vsub.f32 %v2181_v30, %v749_v51 }
 0x256   :  { %v752_v60 = vsub.f32 %v750_v53, %v751_v40 }
 0x258   :  { %v759_v39 = vadd.f32 1e-05, %v752_v60 }
 0x25a   :  { %1705 = vrsqrt.f32 %v759_v39  ;;  %vm766_vm7 = vweird.f32 %v759_v39 }
 0x260   :  { %v1706_v54 = vpop.eup %1705 }
 0x261   :  { %v761_v55 = vmul.f32 %v1706_v54, %v759_v39  ;;  %vm767_vm6 = vweird.f32 %v1706_v54 }
 0x262   :  { %vm768_vm4 = vmor %vm766_vm7, %vm767_vm6  ;;  %vm2575_vm6 = vcmask 1031168   ;;  %vm2576_vm7 = vcmask 900096  }
 0x263   :  { %v762_v57 = vmul.f32 %v1706_v54, %v761_v55 }
 0x265   :  { %v763_v22 = vmul.f32 0.5, %v762_v57  ;;  %v2254_v57 = vpop.permute.xlu2 %990 }
 0x267   :  { %v764_v42 = vsub.f32 1.5, %v763_v22 }
 0x269   :  { %v765_v58 = vmul.f32 %v1706_v54, %v764_v42 }
 0x26b   :  { %v769_v2 = vsel %vm768_vm4, %v1706_v54, %v765_v58  ;;  %vm2577_vm4 = vmmov %vm2575_vm6 }
 0x26c   :  { %v770_v61 = vmul.f32 %v769_v2, %v753_v23  ;;  %v771_v5 = vmul.f32 %v769_v2, %v754_v41  ;;  %v772_v9 = vmul.f32 %v769_v2, %v755_v21  ;;  %v773_v10 = vmul.f32 %v769_v2, %v756_v0 }
 0x26d   :  { %v774_v37 = vmul.f32 %v769_v2, %v757_v50  ;;  %v775_v38 = vmul.f32 %v769_v2, %v758_v35  ;;  %v2258_v22 = vpop.permute.xlu2 %936 }
 0x26e   :  { %v782_v59 = vmul.f32 %v780_v36, %v770_v61  ;;  %v783_v56 = vmul.f32 %v780_v36, %v771_v5  ;;  %v784_v14 = vmul.f32 %v780_v36, %v772_v9  ;;  %v785_v17 = vmul.f32 %v780_v36, %v773_v10 }
 0x26f   :  { %v786_v44 = vmul.f32 %v780_v36, %v774_v37  ;;  %v787_v49 = vmul.f32 %v780_v36, %v775_v38 }
 0x270   :  { %v794_v19 = vadd.f32 %v792_v16, %v782_v59  ;;  %v795_v18 = vadd.f32 %v792_v16, %v783_v56  ;;  %v796_v24 = vadd.f32 %v792_v16, %v784_v14  ;;  %v797_v1 = vadd.f32 %v792_v16, %v785_v17 }
 0x271   :  { %v798_v20 = vadd.f32 %v792_v16, %v786_v44  ;;  %v799_v30 = vadd.f32 %v792_v16, %v787_v49 }
 0x272   :  { %v800_v25 = vmax.f32 %v794_v19, 0.0  ;;  %v801_v43 = vmax.f32 %v795_v18, 0.0  ;;  %v802_v27 = vmax.f32 %v796_v24, 0.0  ;;  %v803_v62 = vmax.f32 %v797_v1, 0.0 }
 0x273   :  { %v804_v51 = vmax.f32 %v798_v20, 0.0  ;;  %v805_v53 = vmax.f32 %v799_v30, 0.0 }
 0x274   :  { %v2197_v63 = vmul.f32 %v2138_v29, %v800_v25  ;;  %v2200_v28 = vmul.f32 %v2141_v31, %v801_v43  ;;  %v2203_v32 = vmul.f32 %v2145_v48, %v802_v27  ;;  %v2206_v33 = vmul.f32 %v2159_v8, %v803_v62 }
 0x275   :  { %v2228_v60 = vmul.f32 %v2168_v15, %v804_v51  ;;  %v2231_v39 = vmul.f32 %v2178_v26, %v805_v53 }
 0x276   :  { %v1609_v34 = vpack.i.bf16 %v2206_v33, %v2203_v32  ;;  %v1584_v47 = vpack.i.bf16 %v2200_v28, %v2197_v63  ;;  %v1634_v52 = vpack.i.bf16 %v2197_v63, %v1771_v11  ;;  %v1639_v40 = vpack.i.bf16 %v2203_v32, %v2200_v28 }
 0x277   :  { %v1654_v54 = vpack.i.bf16 %v2231_v39, %v2228_v60  ;;  %v1699_v55 = vpack.i.bf16 %v2228_v60, %v2206_v33 }
 0x278   :  { %1610 = vrot.lane.b32.xlu1 %v1609_v34, %s1764_s30  ;;  %1605 = vrot.lane.b32.xlu0 %v1609_v34, %s1762_s0 }
 0x279   :  { %1585 = vrot.lane.b32.xlu2 %v1584_v47, %s1763_s29 }
 0x280   :  { %1625 = vrot.lane.b32.xlu0 %v1609_v34, %s1765_s8  ;;  %1635 = vrot.lane.b32.xlu1 %v1634_v52, %s1767_s10 }
 0x281   :  { %1590 = vrot.lane.b32.xlu2 %v1609_v34, %s1763_s29 }
 0x288   :  { %1640 = vrot.lane.b32.xlu0 %v1639_v40, %s1767_s10  ;;  %1650 = vrot.lane.b32.xlu1 %v1639_v40, %s1768_s11 }
 0x289   :  { %1595 = vrot.lane.b32.xlu2 %v1584_v47, %s1762_s0 }
 0x290   :  { %1655 = vrot.lane.b32.xlu0 %v1654_v54, %s1763_s29  ;;  %1665 = vrot.lane.b32.xlu1 %v1639_v40, %s1769_s12 }
 0x291   :  { %1600 = vrot.lane.b32.xlu2 %v1584_v47, %s1764_s30 }
 0x298   :  { %1685 = vrot.lane.b32.xlu0 %v1654_v54, %s1766_s9  ;;  %1675 = vrot.lane.b32.xlu1 %v1654_v54, %s1764_s30 }
 0x299   :  { %1615 = vrot.lane.b32.xlu2 %v1584_v47, %s1765_s8 }
 0x2a0   :  { %858 = vrot.lane.b32.xlu0 %v2231_v39, %s1767_s10  ;;  %1680 = vrot.lane.b32.xlu1 %v1654_v54, %s1765_s8 }
 0x2a1   :  { %1620 = vrot.lane.b32.xlu2 %v1584_v47, %s1766_s9 }
 0x2a8   :  { %1700 = vrot.lane.b32.xlu0 %v1699_v55, %s1769_s12  ;;  %1690 = vrot.lane.b32.xlu1 %v1699_v55, %s1767_s10 }
 0x2a9   :  { %1630 = vrot.lane.b32.xlu2 %v1609_v34, %s1766_s9 }
 0x2b0   :  { %885 = vrot.lane.b32.xlu1 %v2231_v39, %s1768_s11 }
 0x2b1   :  { %1645 = vrot.lane.b32.xlu2 %v1634_v52, %s1768_s11 }
 0x2b9   :  { %1660 = vrot.lane.b32.xlu2 %v1634_v52, %s1769_s12 }
 0x2c1   :  { %1670 = vrot.lane.b32.xlu2 %v1654_v54, %s1762_s0 }
 0x2c9   :  { %1695 = vrot.lane.b32.xlu2 %v1699_v55, %s1768_s11 }
 0x2d1   :  { %831 = vrot.lane.b32.xlu2 %v2231_v39, %s1769_s12 }
 0x2d3   :  { %v1586_v36 = vpop.permute.xlu2 %1585 }
 0x2d4   :  { %v1588_v42 = vunpack.i.h.bf16 %v1586_v36  ;;  %v1587_v58 = vunpack.i.l.bf16 %v1586_v36 }
 0x2d6   :  { %v1060_v23 = vpack.c.bf16 %v1587_v58, %v1587_v58  ;;  %v1019_v41 = vsel %vm2562_vm5, %v1587_v58, %v1588_v42  ;;  %vm2578_vm5 = vmmov %vm2576_vm7 }
 0x2d7   :  { %v1061_v21 = vpack.c.bf16 %v1019_v41, %v1019_v41 }
 0x2d8   :  { %1159 = vrot.lane.b32.xlu1 %v1060_v23, %s1770_s13 }
 0x2d9   :  { %1161 = vrot.lane.b32.xlu0 %v1061_v21, %s1770_s13 }
 0x2db   :  { %v2265_v0 = vpop.permute.xlu2 %1590 }
 0x2dc   :  { %v1593_v2 = vunpack.i.h.bf16 %v2265_v0  ;;  %v1592_v61 = vunpack.i.l.bf16 %v2265_v0 }
 0x2de   :  { %v1020_v5 = vsel %vm2563_vm3, %v1588_v42, %v1592_v61  ;;  %v2273_v9 = vsel %vm2564_vm9, %v1592_v61, %v1593_v2  ;;  %vm2579_vm9 = vcmask 1039360  }
 0x2df   :  { %v1062_v10 = vpack.c.bf16 %v1020_v5, %v1020_v5 }
 0x2e1   :  { %1163 = vrot.lane.b32.xlu2 %v1062_v10, %s1770_s13 }
 0x2e3   :  { %v1596_v59 = vpop.permute.xlu2 %1595 }
 0x2e4   :  { %v1598_v56 = vunpack.i.h.bf16 %v1596_v59  ;;  %v1597_v14 = vunpack.i.l.bf16 %v1596_v59 }
 0x2e6   :  { %v965_v34 = vsel %vm2566_vm13, %v1597_v14, %v1598_v56  ;;  %vm2581_vm13 = vmmov %vm2567_vm2 }
 0x2ea   :  { %v2276_v17 = vpop.permute.xlu1 %1610  ;;  %v2278_v16 = vpop.permute.xlu0 %1605 }
 0x2eb   :  { %v1613_v19 = vunpack.i.h.bf16 %v2276_v17  ;;  %v1612_v18 = vunpack.i.l.bf16 %v2276_v17  ;;  %v1608_v24 = vunpack.i.h.bf16 %v2278_v16  ;;  %v1607_v1 = vunpack.i.l.bf16 %v2278_v16  ;;  %v1601_v25 = vpop.permute.xlu2 %1600 }
 0x2ec   :  { %v1603_v43 = vunpack.i.h.bf16 %v1601_v25  ;;  %v1602_v27 = vunpack.i.l.bf16 %v1601_v25 }
 0x2ed   :  { %v966_v62 = vsel %vm2565_vm11, %v1598_v56, %v1607_v1  ;;  %v2289_v47 = vsel %vm2567_vm2, %v1607_v1, %v1608_v24  ;;  %v2294_v50 = vsel %vm2568_vm12, %v1612_v18, %v1613_v19  ;;  %vm2580_vm11 = vmmov %vm2563_vm3 }
 0x2ee   :  { %v1053_v35 = vpack.c.bf16 %v1602_v27, %v1597_v14  ;;  %v993_v37 = vsel %vm2569_vm0, %v1603_v43, %v1612_v18  ;;  %v992_v38 = vsel %vm2570_vm1, %v1602_v27, %v1603_v43  ;;  %vm2582_vm12 = vmmov %vm2569_vm0 }
 0x2ef   :  { %v1055_v49 = vpack.c.bf16 %v993_v37, %v966_v62  ;;  %v1054_v52 = vpack.c.bf16 %v992_v38, %v965_v34  ;;  %vm2583_vm1 = vmmov %vm2578_vm5 }
 0x2f0   :  { %1145 = vrot.lane.b32.xlu1 %v1053_v35, %s1770_s13 }
 0x2f1   :  { %1149 = vrot.lane.b32.xlu2 %v1055_v49, %s1770_s13  ;;  %1147 = vrot.lane.b32.xlu0 %v1054_v52, %s1770_s13 }
 0x2f2   :  { %v2303_v20 = vpop.permute.xlu1 %1635  ;;  %v2305_v51 = vpop.permute.xlu0 %1625 }
 0x2f3   :  { %v1616_v30 = vpop.permute.xlu2 %1615  ;;  %v1627_v61 = vunpack.i.l.bf16 %v2305_v51  ;;  %v1638_v37 = vunpack.i.h.bf16 %v2303_v20  ;;  %v1628_v16 = vunpack.i.h.bf16 %v2305_v51 }
 0x2f4   :  { %v1618_v53 = vunpack.i.h.bf16 %v1616_v30  ;;  %v1617_v40 = vunpack.i.l.bf16 %v1616_v30 }
 0x2f6   :  { %v912_v23 = vsel %vm2571_vm10, %v1617_v40, %v1618_v53  ;;  %v913_v14 = vsel %vm2573_vm8, %v1618_v53, %v1627_v61  ;;  %vm2584_vm10 = vmmov %vm2577_vm4 }
 0x2fa   :  { %v2307_v54 = vpop.permute.xlu1 %1650  ;;  %v2316_v10 = vpop.permute.xlu0 %1640 }
 0x2fb   :  { %v1621_v55 = vpop.permute.xlu2 %1620  ;;  %v1643_v25 = vunpack.i.h.bf16 %v2316_v10  ;;  %v1642_v43 = vunpack.i.l.bf16 %v2316_v10  ;;  %v1653_v27 = vunpack.i.h.bf16 %v2307_v54  ;;  %v1652_v62 = vunpack.i.l.bf16 %v2307_v54 }
 0x2fc   :  { %v1623_v36 = vunpack.i.h.bf16 %v1621_v55  ;;  %v1622_v42 = vunpack.i.l.bf16 %v1621_v55 }
 0x2fd   :  { %v862_v49 = vsel %vm2575_vm6, %v1642_v43, %v1643_v25  ;;  %v889_v52 = vsel %vm2576_vm7, %v1652_v62, %v1653_v27  ;;  %v861_v53 = vsel %vm2577_vm4, %v1638_v37, %v1642_v43  ;;  %vm2587_vm6 = vmmov %vm2569_vm0 }
 0x2fe   :  { %v1046_v58 = vpack.c.bf16 %v1622_v42, %v1617_v40  ;;  %v938_v41 = vsel %vm2572_vm14, %v1622_v42, %v1623_v36  ;;  %v1041_v55 = vpack.c.bf16 %v889_v52, %v862_v49  ;;  %vm2585_vm14 = vmmov %vm2573_vm8 }
 0x2ff   :  { %v1047_v21 = vpack.c.bf16 %v938_v41, %v912_v23  ;;  %vm2586_vm8 = vmmov %vm2567_vm2 }
 0x300   :  { %1131 = vrot.lane.b32.xlu1 %v1046_v58, %s1770_s13  ;;  %vm2588_vm7 = vmmov %vm2563_vm3 }
 0x301   :  { %1133 = vrot.lane.b32.xlu0 %v1047_v21, %s1770_s13  ;;  %vm2589_vm4 = vmmov %vm2574_vm15 }
 0x302   :  { %v2314_v5 = vpop.permute.xlu1 %1665  ;;  %v1656_v30 = vpop.permute.xlu0 %1655 }
 0x303   :  { %v2318_v59 = vpop.permute.xlu2 %1630  ;;  %v1658_v42 = vunpack.i.h.bf16 %v1656_v30  ;;  %v1657_v58 = vunpack.i.l.bf16 %v1656_v30  ;;  %v1667_v0 = vunpack.i.l.bf16 %v2314_v5 }
 0x304   :  { %v1632_v56 = vunpack.i.l.bf16 %v2318_v59  ;;  %v1633_v17 = vunpack.i.h.bf16 %v2318_v59 }
 0x305   :  { %v1024_v30 = vsel %vm2580_vm11, %v1658_v42, %v2188_v45  ;;  %vm2592_vm11 = vmmov %vm2583_vm1 }
 0x306   :  { %v939_v18 = vsel %vm2574_vm15, %v1623_v36, %v1632_v56 }
 0x307   :  { %v1048_v1 = vpack.c.bf16 %v939_v18, %v913_v14  ;;  %v1023_v18 = vsel %vm2563_vm3, %v1657_v58, %v1658_v42  ;;  %v1637_v42 = vunpack.i.l.bf16 %v2303_v20  ;;  %vm2591_vm3 = vmmov %vm2585_vm14 }
 0x309   :  { %1135 = vrot.lane.b32.xlu2 %v1048_v1, %s1770_s13  ;;  %v860_v20 = vsel %vm2584_vm10, %v1637_v42, %v1638_v37  ;;  %v940_v42 = vsel %vm2589_vm4, %v1632_v56, %v1633_v17 }
 0x30a   :  { %v2332_v34 = vpop.permute.xlu1 %1675  ;;  %v2356_v49 = vpop.permute.xlu0 %1685 }
 0x30b   :  { %v1646_v35 = vpop.permute.xlu2 %1645 }
 0x30c   :  { %v1648_v38 = vunpack.i.h.bf16 %v1646_v35  ;;  %v1647_v44 = vunpack.i.l.bf16 %v1646_v35 }
 0x30e   :  { %v888_v40 = vsel %vm2578_vm5, %v1648_v38, %v1652_v62  ;;  %v1065_v62 = vpack.c.bf16 %v1023_v18, %v1023_v18  ;;  %v1677_v18 = vunpack.i.l.bf16 %v2332_v34  ;;  %vm2590_vm5 = vmmov %vm2589_vm4 }
 0x30f   :  { %v1040_v36 = vpack.c.bf16 %v888_v40, %v861_v53  ;;  %v1066_v40 = vpack.c.bf16 %v1024_v30, %v1024_v30 }
 0x311   :  { %1121 = vrot.lane.b32.xlu2 %v1041_v55, %s1770_s13  ;;  %1119 = vrot.lane.b32.xlu0 %v1040_v36, %s1770_s13  ;;  %v1063_v55 = vpack.c.bf16 %v2273_v9, %v2273_v9 }
 0x312   :  { %v2345_v23 = vpop.permute.xlu1 %1680 }
 0x313   :  { %v2347_v41 = vpop.permute.xlu2 %1660  ;;  %v1682_v35 = vunpack.i.l.bf16 %v2345_v23 }
 0x314   :  { %v1663_v21 = vunpack.i.h.bf16 %v2347_v41  ;;  %v1662_v14 = vunpack.i.l.bf16 %v2347_v41 }
 0x316   :  { %v833_v1 = vsel %vm2579_vm9, %v1662_v14, %v1663_v21  ;;  %v834_v59 = vsel %vm2579_vm9, %v1663_v21, %v1667_v0 }
 0x317   :  { %v1032_v43 = vpack.c.bf16 %v833_v1, %v1771_v11  ;;  %v1678_v11 = vunpack.i.h.bf16 %v2332_v34  ;;  %v859_v1 = vpop.permute.xlu0 %858  ;;  %v995_v34 = vsel %vm2569_vm0, %v1613_v19, %v1677_v18  ;;  %v915_v19 = vsel %vm2585_vm14, %v1628_v16, %v1682_v35  ;;  %vm2596_vm0 = vmmov %vm2579_vm9 }
 0x318   :  { %v1033_v51 = vpack.c.bf16 %v834_v59, %v2197_v63  ;;  %vm2599_vm14 = vcmask 154624   ;;  %vm2607_vm9 = vmmov %vm2596_vm0 }
 0x319   :  { %1103 = vrot.lane.b32.xlu2 %v1032_v43, %s1770_s13  ;;  %1169 = vrot.lane.b32.xlu0 %v1065_v62, %s1770_s13  ;;  %v996_v30 = vsel %vm2582_vm12, %v1677_v18, %v1678_v11  ;;  %v997_v18 = vsel %vm2587_vm6, %v1678_v11, %v2254_v57 }
 0x31a   :  { %v2360_v52 = vpop.permute.xlu1 %1690 }
 0x31b   :  { %v1671_v53 = vpop.permute.xlu2 %1670  ;;  %v1693_v56 = vunpack.i.h.bf16 %v2360_v52 }
 0x31c   :  { %v1673_v36 = vunpack.i.h.bf16 %v1671_v53  ;;  %v1672_v14 = vunpack.i.l.bf16 %v1671_v53 }
 0x31e   :  { %v969_v45 = vsel %vm2581_vm13, %v1672_v14, %v1673_v36  ;;  %v968_v9 = vsel %vm2567_vm2, %v1608_v24, %v1672_v14  ;;  %v1687_v24 = vunpack.i.l.bf16 %v2356_v49  ;;  %vm2593_vm13 = vmmov %vm2583_vm1 }
 0x31f   :  { %v1058_v53 = vpack.c.bf16 %v996_v30, %v969_v45  ;;  %v1022_v45 = vsel %vm2588_vm7, %v1593_v2, %v1657_v58  ;;  %v914_v58 = vsel %vm2591_vm3, %v1627_v61, %v1628_v16  ;;  %v1668_v61 = vunpack.i.h.bf16 %v2314_v5  ;;  %vm2594_vm2 = vmmov %vm2584_vm10 }
 0x320   :  { %v1049_v30 = vpack.c.bf16 %v940_v42, %v914_v58  ;;  %vm2595_vm12 = vmmov %vm2594_vm2 }
 0x321   :  { %1171 = vrot.lane.b32.xlu2 %v1066_v40, %s1770_s13  ;;  %1165 = vrot.lane.b32.xlu0 %v1063_v55, %s1770_s13  ;;  %v1057_v40 = vpack.c.bf16 %v995_v34, %v968_v9  ;;  %v887_v55 = vsel %vm2583_vm1, %v1647_v44, %v1648_v38  ;;  %v970_v44 = vsel %vm2586_vm8, %v1673_v36, %v2190_v46  ;;  %v1688_v46 = vunpack.i.h.bf16 %v2356_v49  ;;  %vm2597_vm1 = vmmov %vm2596_vm0 }
 0x322   :  { %v886_v43 = vpop.permute.xlu1 %885  ;;  %v1039_v14 = vpack.c.bf16 %v887_v55, %v860_v20  ;;  %v941_v38 = vsel %vm2574_vm15, %v1633_v17, %v1687_v24  ;;  %v1683_v36 = vunpack.i.h.bf16 %v2345_v23  ;;  %v1064_v9 = vpack.c.bf16 %v1022_v45, %v1022_v45  ;;  %v1701_v55 = vpop.permute.xlu0 %1700  ;;  %vm2598_vm10 = vmmov %vm2596_vm0 }
 0x323   :  { %v1045_v62 = vpack.c.bf16 %v886_v43, %v859_v1  ;;  %v1050_v37 = vpack.c.bf16 %v941_v38, %v915_v19  ;;  %v1696_v57 = vpop.permute.xlu2 %1695  ;;  %v943_v2 = vsel %vm2590_vm5, %v1688_v46, %v2258_v22  ;;  %v1692_v22 = vunpack.i.l.bf16 %v2360_v52  ;;  %vm2600_vm8 = vmmov %vm2599_vm14 }
 0x324   :  { %v1052_v11 = vpack.c.bf16 %v943_v2, %v1683_v36  ;;  %v1698_v34 = vunpack.i.h.bf16 %v1696_v57  ;;  %v865_v16 = vsel %vm2595_vm12, %v1693_v56, %v859_v1  ;;  %v1703_v63 = vunpack.i.h.bf16 %v1701_v55  ;;  %vm2604_vm7 = vmmov %vm2591_vm3 }
 0x325   :  { %1129 = vrot.lane.b32.xlu1 %v1045_v62, %s1770_s13  ;;  %v1059_v62 = vpack.c.bf16 %v997_v18, %v970_v44  ;;  %v863_v21 = vsel %vm2594_vm2, %v1643_v25, %v1692_v22  ;;  %v835_v5 = vsel %vm2596_vm0, %v1667_v0, %v1668_v61  ;;  %v2601_v18 = vpack.c.bf16 %v2294_v50, %v2289_v47  ;;  %vm2605_vm5 = vmmov %vm2592_vm11 }
 0x326   :  { %v892_v41 = vsel %vm2593_vm13, %v1698_v34, %v886_v43  ;;  %vm2602_vm15 = vcmask 1043456   ;;  %v942_v45 = vsel %vm2589_vm4, %v1687_v24, %v1688_v46  ;;  %vm2606_vm3 = vmmov %vm2594_vm2 }
 0x327   :  { %v1044_v20 = vpack.c.bf16 %v892_v41, %v865_v16  ;;  %vm2603_vm6 = vmmov %vm2602_vm15 }
 0x328   :  { %vm2609_vm13 = vmmov %vm2600_vm8 }
 0x329   :  { %1155 = vrot.lane.b32.xlu2 %v1058_v53, %s1770_s13  ;;  %1153 = vrot.lane.b32.xlu0 %v1057_v40, %s1770_s13  ;;  %v1697_v53 = vunpack.i.l.bf16 %v1696_v57  ;;  %vm2610_vm2 = vmmov %vm2600_vm8 }
 0x32a   :  { %vm2611_vm12 = vmmov %vm2610_vm2 }
 0x32b   :  { %v890_v40 = vsel %vm2592_vm11, %v1653_v27, %v1697_v53  ;;  %v832_v54 = vpop.permute.xlu2 %831  ;;  %v1034_v27 = vpack.c.bf16 %v835_v5, %v2200_v28  ;;  %v891_v50 = vsel %vm2605_vm5, %v1697_v53, %v1698_v34  ;;  %vm2608_vm11 = vmmov %vm2600_vm8  ;;  %vm2621_vm5 = vcmask 588800  }
 0x32c   :  { %v1042_v52 = vpack.c.bf16 %v890_v40, %v863_v21  ;;  %v838_v43 = vsel %vm2597_vm1, %v1703_v63, %v832_v54  ;;  %vm2612_vm0 = vmmov %vm2610_vm2 }
 0x32d   :  { %1117 = vrot.lane.b32.xlu1 %v1039_v14, %s1770_s13  ;;  %v1702_v14 = vunpack.i.l.bf16 %v1701_v55  ;;  %v1037_v25 = vpack.c.bf16 %v838_v43, %v2228_v60  ;;  %vm2613_vm1 = vmmov %vm2612_vm0 }
 0x32f   :  { %v837_v10 = vsel %vm2598_vm10, %v1702_v14, %v1703_v63  ;;  %vm2614_vm10 = vmmov %vm2603_vm6 }
 0x330   :  { %v1036_v1 = vpack.c.bf16 %v837_v10, %v2206_v33  ;;  %vm2620_vm4 = vmmov %vm2614_vm10 }
 0x331   :  { %1139 = vrot.lane.b32.xlu2 %v1050_v37, %s1770_s13  ;;  %1157 = vrot.lane.b32.xlu0 %v1059_v62, %s1770_s13  ;;  %v1038_v37 = vpack.c.bf16 %v832_v54, %v2231_v39  ;;  %v916_v62 = vsel %vm2604_vm7, %v1682_v35, %v1683_v36  ;;  %v836_v39 = vsel %vm2607_vm9, %v1668_v61, %v1702_v14  ;;  %vm2619_vm7 = vmmov %vm2612_vm0 }
 0x332   :  { %v1051_v47 = vpack.c.bf16 %v942_v45, %v916_v62  ;;  %v1035_v24 = vpack.c.bf16 %v836_v39, %v2203_v32  ;;  %vm2623_vm9 = vmmov %vm2612_vm0 }
 0x335   :  { %1167 = vrot.lane.b32.xlu1 %v1064_v9, %s1770_s13  ;;  %v864_v9 = vsel %vm2606_vm3, %v1692_v22, %v1693_v56  ;;  %vm2622_vm3 = vmmov %vm2612_vm0 }
 0x336   :  { %v1043_v42 = vpack.c.bf16 %v891_v50, %v864_v9 }
 0x339   :  { %1143 = vrot.lane.b32.xlu2 %v1052_v11, %s1770_s13  ;;  %1137 = vrot.lane.b32.xlu0 %v1049_v30, %s1770_s13 }
 0x33b   :  { %v1164_v19 = vpop.permute.xlu2 %1163 }
 0x33d   :  { %1105 = vrot.lane.b32.xlu1 %v1033_v51, %s1770_s13 }
 0x341   :  { %1123 = vrot.lane.b32.xlu2 %v1042_v52, %s1770_s13  ;;  %1127 = vrot.lane.b32.xlu0 %v1044_v20, %s1770_s13 }
 0x345   :  { %1107 = vrot.lane.b32.xlu1 %v1034_v27, %s1770_s13 }
 0x349   :  { %1113 = vrot.lane.b32.xlu2 %v1037_v25, %s1770_s13  ;;  %1111 = vrot.lane.b32.xlu0 %v1036_v1, %s1770_s13  ;;  %v1067_v1 = vld [vmem:[%s2542_s2] sm:$0xf] }
 0x34a   :  { %v1160_v17 = vpop.permute.xlu1 %1159 }
 0x34b   :  { %v1162_v44 = vpop.permute.xlu0 %1161  ;;  %v1150_v35 = vpop.permute.xlu2 %1149 }
 0x34c   :  { %v1197_v38 = vsel %vm2599_vm14, %v1160_v17, %v1162_v44  ;;  %v1198_v28 = vsel %vm2600_vm8, %v1162_v44, %v1164_v19  ;;  %vm2615_vm14 = vmmov %vm2612_vm0 }
 0x34d   :  { %1151 = vrot.lane.b32.xlu1 %v2601_v18, %s1770_s13  ;;  %v1231_v60 = vsel %vm2602_vm15, %v1197_v38, 0  ;;  %v1234_v33 = vsel %vm2603_vm6, %v1198_v28, 0  ;;  %vm2616_vm8 = vmmov %vm2612_vm0 }
 0x34e   :  { %1251 = vmatpush.bf16.msrb.mxu2 %v1231_v60  ;;  %1264 = vmatpush.bf16.msrb.mxu3 %v1234_v33  ;;  %vm2617_vm15 = vmmov %vm2603_vm6 }
 0x34f   :  { %vm2618_vm6 = vmmov %vm2612_vm0 }
 0x351   :  { %1115 = vrot.lane.b32.xlu0 %v1038_v37, %s1770_s13 }
 0x355   :  { %1141 = vrot.lane.b32.xlu1 %v1051_v47, %s1770_s13 }
 0x35d   :  { %1125 = vrot.lane.b32.xlu1 %v1043_v42, %s1770_s13 }
 0x362   :  { %v1146_v23 = vpop.permute.xlu1 %1145 }
 0x363   :  { %v1148_v36 = vpop.permute.xlu0 %1147  ;;  %v1136_v0 = vpop.permute.xlu2 %1135 }
 0x364   :  { %v1191_v57 = vsel %vm2608_vm11, %v1146_v23, %v1148_v36  ;;  %v1192_v49 = vsel %vm2609_vm13, %v1148_v36, %v1150_v35  ;;  %vm2624_vm11 = vmmov %vm2612_vm0 }
 0x365   :  { %1252 = vmatpush.bf16.msrb.mxu2 %v1191_v57  ;;  %1265 = vmatpush.bf16.msrb.mxu3 %v1192_v49  ;;  %vm2625_vm13 = vmmov %vm2620_vm4 }
 0x366   :  { %1109 = vrot.lane.b32.xlu1 %v1035_v24, %s1770_s13 }
 0x36b   :  { %v1122_v30 = vpop.permute.xlu2 %1121 }
 0x372   :  { %v1132_v46 = vpop.permute.xlu1 %1131 }
 0x373   :  { %v1134_v2 = vpop.permute.xlu0 %1133  ;;  %v1104_v32 = vpop.permute.xlu2 %1103 }
 0x374   :  { %v1185_v58 = vsel %vm2610_vm2, %v1132_v46, %v1134_v2  ;;  %v1186_v11 = vsel %vm2611_vm12, %v1134_v2, %v1136_v0  ;;  %vm2626_vm2 = vmmov %vm2621_vm5 }
 0x375   :  { %1253 = vmatpush.bf16.msrb.mxu2 %v1185_v58  ;;  %1266 = vmatpush.bf16.msrb.mxu3 %v1186_v11  ;;  %vm2627_vm12 = vmmov %vm2612_vm0 }
 0x37b   :  { %v1172_v41 = vpop.permute.xlu2 %1171 }
 0x383   :  { %v1120_v34 = vpop.permute.xlu0 %1119  ;;  %v1156_v52 = vpop.permute.xlu2 %1155 }
 0x384   :  { %v1180_v53 = vsel %vm2612_vm0, %v1120_v34, %v1122_v30 }
 0x385   :  { %1267 = vmatpush.bf16.msrb.mxu3 %v1180_v53 }
 0x38b   :  { %v1170_v59 = vpop.permute.xlu0 %1169  ;;  %v1140_v10 = vpop.permute.xlu2 %1139 }
 0x393   :  { %v1166_v56 = vpop.permute.xlu0 %1165  ;;  %v1144_v60 = vpop.permute.xlu2 %1143 }
 0x394   :  { %v1199_v22 = vsel %vm2613_vm1, %v1164_v19, %v1166_v56  ;;  %v1202_v19 = vsel %vm2623_vm9, %v1170_v59, %v1172_v41  ;;  %vm2628_vm1 = vmmov %vm2612_vm0 }
 0x395   :  { %v1237_v51 = vsel %vm2614_vm10, %v1199_v22, 0  ;;  %v1246_v28 = vsel %vm2625_vm13, %v1202_v19, 0  ;;  %vm2629_vm10 = vmmov %vm2612_vm0 }
 0x396   :  { %1277 = vmatpush.bf16.msra.mxu0 %v1237_v51  ;;  %vm2638_vm9 = vmmov %vm2612_vm0  ;;  %v1379_v51 = vld [vmem:[%s2545_s5] sm:$0xff]  ;;  %s1773_s5 = smov [#allocation5]  }
 0x397   :  { %v1130_v61 = vpop.permute.xlu1 %1129  ;;  %vm2640_vm13 = vmmov %vm2626_vm2  ;;  %1382 = vperm.xlu0 %1704, %v1379_v51  }
 0x39b   :  { %v1154_v40 = vpop.permute.xlu0 %1153  ;;  %v1124_v42 = vpop.permute.xlu2 %1123 }
 0x39c   :  { %v1195_v17 = vsel %vm2622_vm3, %v1154_v40, %v1156_v52  ;;  %vm2637_vm3 = vmmov %vm2612_vm0 }
 0x39f   :  { %v1118_v55 = vpop.permute.xlu1 %1117 }
 0x3a0   :  { %v1179_v21 = vsel %vm2615_vm14, %v1118_v55, %v1120_v34  ;;  %vm2630_vm14 = vmmov %vm2612_vm0 }
 0x3a1   :  { %1254 = vmatpush.bf16.msrb.mxu2 %v1179_v21 }
 0x3a3   :  { %v1158_v16 = vpop.permute.xlu0 %1157  ;;  %v1114_v46 = vpop.permute.xlu2 %1113 }
 0x3a4   :  { %v1196_v33 = vsel %vm2627_vm12, %v1156_v52, %v1158_v16  ;;  %vm2642_vm12 = vmmov %vm2612_vm0 }
 0x3a7   :  { %v1168_v20 = vpop.permute.xlu1 %1167 }
 0x3a8   :  { %v1200_v63 = vsel %vm2616_vm8, %v1166_v56, %v1168_v20  ;;  %v1201_v5 = vsel %vm2618_vm6, %v1168_v20, %v1170_v59  ;;  %vm2631_vm8 = vmmov %vm2612_vm0 }
 0x3a9   :  { %v1240_v14 = vsel %vm2617_vm15, %v1200_v63, 0  ;;  %v1243_v25 = vsel %vm2620_vm4, %v1201_v5, 0  ;;  %v1181_v23 = vsel %vm2631_vm8, %v1122_v30, %v1124_v42  ;;  %vm2632_vm15 = vmmov %vm2612_vm0 }
 0x3aa   :  { %1290 = vmatpush.bf16.msra.mxu1 %v1240_v14  ;;  %vm2633_vm6 = vmmov %vm2612_vm0 }
 0x3ab   :  { %v1138_v27 = vpop.permute.xlu0 %1137  ;;  %vm2635_vm4 = vmmov %vm2612_vm0 }
 0x3ac   :  { %v1187_v50 = vsel %vm2629_vm10, %v1136_v0, %v1138_v27  ;;  %v1188_v9 = vsel %vm2630_vm14, %v1138_v27, %v1140_v10 }
 0x3af   :  { %v1106_v54 = vpop.permute.xlu1 %1105 }
 0x3b0   :  { %v1173_v43 = vsel %vm2619_vm7, %v1104_v32, %v1106_v54  ;;  %vm2634_vm7 = vmmov %vm2612_vm0 }
 0x3b1   :  { %1255 = vmatpush.bf16.msrb.mxu2 %v1173_v43 }
 0x3b3   :  { %v1128_v18 = vpop.permute.xlu0 %1127 }
 0x3b4   :  { %1444 = vmatmul.msk.bf16.vlgmr.msrb.gmra.mxu2 %vm2621_vm5, %v1067_v1  ;;  %vm2636_vm5 = vmmov %vm2612_vm0 }
 0x3b5   :  { %1303 = vmatpush.bf16.msra.mxu2 %v1243_v25 }
 0x3b7   :  { %v1108_v44 = vpop.permute.xlu1 %1107 }
 0x3b8   :  { %v1174_v38 = vsel %vm2624_vm11, %v1106_v54, %v1108_v44  ;;  %vm2639_vm11 = vmmov %vm2626_vm2 }
 0x3b9   :  { %1304 = vmatpush.bf16.msra.mxu2 %v1195_v17  ;;  %1268 = vmatpush.bf16.msrb.mxu3 %v1174_v38 }
 0x3bb   :  { %v1112_v47 = vpop.permute.xlu0 %1111 }
 0x3bc   :  { %1445 = vmatmul.msk.bf16.vlgmr.msrb.gmra.mxu3 %vm2626_vm2, %v1067_v1  ;;  %v1177_v11 = vsel %vm2638_vm9, %v1112_v47, %v1114_v46  ;;  %vm2641_vm2 = vmmov %vm2612_vm0 }
 0x3bd   :  { %1316 = vmatpush.bf16.msra.mxu3 %v1246_v28 }
 0x3bf   :  { %v1152_v37 = vpop.permute.xlu1 %1151 }
 0x3c0   :  { %v1193_v62 = vsel %vm2612_vm0, %v1150_v35, %v1152_v37  ;;  %v1194_v45 = vsel %vm2628_vm1, %v1152_v37, %v1154_v40  ;;  %v1184_v35 = vsel %vm2634_vm7, %v1128_v18, %v1130_v61  ;;  %vm2643_vm0 = vmmov %vm2639_vm11  ;;  %v1391_v61 = vld [vmem:[%s2546_s6] sm:$0xff]  ;;  %s1420_s6 = sshll.u32 %s1773_s5, 4  ;;  %s1421_s6 = int_to_ptr.vmem [resolvable:$true] %s1420_s6 }
 0x3c1   :  { %1317 = vmatpush.bf16.msra.mxu3 %v1196_v33  ;;  %1278 = vmatpush.bf16.msra.mxu0 %v1193_v62  ;;  %vm2644_vm1 = vmmov %vm2643_vm0 }
 0x3c2   :  { %1291 = vmatpush.bf16.msra.mxu1 %v1194_v45  ;;  %1394 = vperm.xlu0 %1704, %v1391_v61  }
 0x3c3   :  { %v1116_v49 = vpop.permute.xlu0 %1115 }
 0x3c4   :  { %v1178_v58 = vsel %vm2637_vm3, %v1114_v46, %v1116_v49 }
 0x3c5   :  { %1279 = vmatpush.bf16.msra.mxu0 %v1187_v50 }
 0x3c6   :  { %1292 = vmatpush.bf16.msra.mxu1 %v1188_v9 }
 0x3c7   :  { %v1142_v39 = vpop.permute.xlu1 %1141 }
 0x3c8   :  { %v1189_v36 = vsel %vm2632_vm15, %v1140_v10, %v1142_v39  ;;  %v1190_v57 = vsel %vm2633_vm6, %v1142_v39, %v1144_v60 }
 0x3c9   :  { %1280 = vmatpush.bf16.msra.mxu0 %v1181_v23  ;;  %1305 = vmatpush.bf16.msra.mxu2 %v1189_v36 }
 0x3ca   :  { %1318 = vmatpush.bf16.msra.mxu3 %v1190_v57 }
 0x3ce   :  { %1319 = vmatpush.bf16.msra.mxu3 %v1184_v35 }
 0x3cf   :  { %v1126_v24 = vpop.permute.xlu1 %1125 }
 0x3d0   :  { %v1182_v0 = vsel %vm2635_vm4, %v1124_v42, %v1126_v24  ;;  %v1183_v2 = vsel %vm2636_vm5, %v1126_v24, %v1128_v18 }
 0x3d1   :  { %1293 = vmatpush.bf16.msra.mxu1 %v1182_v0  ;;  %1306 = vmatpush.bf16.msra.mxu2 %v1183_v2 }
 0x3d2   :  { %1320 = vmatpush.bf16.msra.mxu3 %v1178_v58 }
 0x3d5   :  { %1449 = vmatmul.msk.bf16.vlgmr.msra.gmra.mxu3 %vm2639_vm11, %v1067_v1  ;;  %1307 = vmatpush.bf16.msra.mxu2 %v1177_v11 }
 0x3d8   :  { %v1110_v30 = vpop.permute.xlu1 %1109  ;;  %1448 = vmatmul.msk.bf16.vlgmr.msra.gmra.mxu2 %vm2640_vm13, %v1067_v1 }
 0x3d9   :  { %v1175_v34 = vsel %vm2641_vm2, %v1108_v44, %v1110_v30  ;;  %v1176_v53 = vsel %vm2642_vm12, %v1110_v30, %v1112_v47 }
 0x3da   :  { %1281 = vmatpush.bf16.msra.mxu0 %v1175_v34  ;;  %1294 = vmatpush.bf16.msra.mxu1 %v1176_v53 }
 0x3dd   :  { %1446 = vmatmul.msk.bf16.vlgmr.msra.gmra.mxu0 %vm2643_vm0, %v1067_v1  ;;  %1447 = vmatmul.msk.bf16.vlgmr.msra.gmra.mxu1 %vm2644_vm1, %v1067_v1 }
 0x409   :  { %v1383_v35 = vpop.permute.xlu0 %1382 }
 0x437   :  { %v2509_v59 = vpop.f32.mrf.mxu2 }
 0x438   :  { %v1326_v40 = vmul.f32 %v2138_v29, %v2509_v59 }
 0x43a   :  { %v1339_v21 = vmul.f32 %v1326_v40, %v2509_v59 }
 0x43f   :  { %v2511_v32 = vpop.f32.mrf.mxu3  ;;  %v1259_v56 = vpop.f32.mrf.mxu2 }
 0x440   :  { %v1327_v41 = vmul.f32 %v2141_v31, %v2511_v32 }
 0x442   :  { %v1340_v16 = vmul.f32 %v1327_v41, %v2511_v32  ;;  %v1332_v63 = vadd.f32 %v1327_v41, %v1326_v40 }
 0x444   :  { %v1345_v27 = vadd.f32 %v1340_v16, %v1339_v21 }
 0x447   :  { %v1272_v22 = vpop.f32.mrf.mxu3 }
 0x458   :  { %v1322_v55 = vpop.f32.mrf.mxu3 }
 0x459   :  { %v1331_v31 = vmul.f32 %v2178_v26, %v1322_v55 }
 0x45a   :  { %v1283_v52 = vpop.f32.mrf.mxu0  ;;  %v1296_v20 = vpop.f32.mrf.mxu1 }
 0x45b   :  { %v1328_v14 = vmul.f32 %v2145_v48, %v1283_v52  ;;  %v1329_v5 = vmul.f32 %v2159_v8, %v1296_v20  ;;  %v1309_v54 = vpop.f32.mrf.mxu2  ;;  %v1344_v8 = vmul.f32 %v1331_v31, %v1322_v55 }
 0x45c   :  { %v1330_v29 = vmul.f32 %v2168_v15, %v1309_v54 }
 0x45d   :  { %v1333_v43 = vadd.f32 %v1332_v63, %v1328_v14  ;;  %v1341_v10 = vmul.f32 %v1328_v14, %v1283_v52  ;;  %v1342_v17 = vmul.f32 %v1329_v5, %v1296_v20  ;;  %v1395_v14 = vpop.permute.xlu0 %1394 }
 0x45e   :  { %v1343_v38 = vmul.f32 %v1330_v29, %v1309_v54 }
 0x45f   :  { %v1346_v25 = vadd.f32 %v1345_v27, %v1341_v10  ;;  %v1334_v1 = vadd.f32 %v1333_v43, %v1329_v5 }
 0x460   :  { %v1324_v19 = vpop.f32.mrf.mxu3 }
 0x461   :  { %v1335_v44 = vadd.f32 %v1334_v1, %v1330_v29  ;;  %v1347_v28 = vadd.f32 %v1346_v25, %v1342_v17 }
 0x462   :  { %v1285_v18 = vpop.f32.mrf.mxu0  ;;  %v1298_v60 = vpop.f32.mrf.mxu1 }
 0x463   :  { %v1311_v48 = vpop.f32.mrf.mxu2  ;;  %v1336_v33 = vadd.f32 %v1335_v44, %v1331_v31  ;;  %v1348_v37 = vadd.f32 %v1347_v28, %v1343_v38 }
 0x465   :  { %1337 = vadd.xlane.f32.xlu2 %v1336_v33  ;;  %v1349_v62 = vadd.f32 %v1348_v37, %v1344_v8 }
 0x467   :  { %1350 = vadd.xlane.f32.xlu1 %v1349_v62 }
 0x4d8   :  { %v1338_v45 = vpop.xlane.xlu2 %1337 }
 0x4d9   :  { %v1352_v15 = vmul.f32 0.001953125, %v1338_v45 }
 0x4da   :  { %v1351_v47 = vpop.xlane.xlu1 %1350 }
 0x4db   :  { %v1353_v26 = vmul.f32 0.001953125, %v1351_v47  ;;  %v1354_v50 = vmul.f32 %v1352_v15, %v1352_v15  ;;  %v1356_v46 = vsub.f32 %v2509_v59, %v1352_v15  ;;  %v1357_v0 = vsub.f32 %v2511_v32, %v1352_v15 }
 0x4dc   :  { %v1358_v2 = vsub.f32 %v1283_v52, %v1352_v15  ;;  %v1359_v58 = vsub.f32 %v1296_v20, %v1352_v15  ;;  %v1360_v30 = vsub.f32 %v1309_v54, %v1352_v15  ;;  %v1361_v34 = vsub.f32 %v1322_v55, %v1352_v15 }
 0x4dd   :  { %v1355_v9 = vsub.f32 %v1353_v26, %v1354_v50 }
 0x4df   :  { %v1362_v42 = vadd.f32 1e-05, %v1355_v9 }
 0x4e1   :  { %1707 = vrsqrt.f32 %v1362_v42  ;;  %vm1369_vm14 = vweird.f32 %v1362_v42 }
 0x4e7   :  { %v1708_v39 = vpop.eup %1707 }
 0x4e8   :  { %v1364_v23 = vmul.f32 %v1708_v39, %v1362_v42  ;;  %vm1370_vm10 = vweird.f32 %v1708_v39 }
 0x4e9   :  { %vm1371_vm8 = vmor %vm1369_vm14, %vm1370_vm10 }
 0x4ea   :  { %v1365_v36 = vmul.f32 %v1708_v39, %v1364_v23 }
 0x4ec   :  { %v1366_v57 = vmul.f32 0.5, %v1365_v36 }
 0x4ee   :  { %v1367_v49 = vsub.f32 1.5, %v1366_v57 }
 0x4f0   :  { %v1368_v24 = vmul.f32 %v1708_v39, %v1367_v49 }
 0x4f2   :  { %v1372_v11 = vsel %vm1371_vm8, %v1708_v39, %v1368_v24 }
 0x4f3   :  { %v1373_v53 = vmul.f32 %v1372_v11, %v1356_v46  ;;  %v1374_v56 = vmul.f32 %v1372_v11, %v1357_v0  ;;  %v1375_v22 = vmul.f32 %v1372_v11, %v1358_v2  ;;  %v1376_v51 = vmul.f32 %v1372_v11, %v1359_v58 }
 0x4f4   :  { %v1377_v61 = vmul.f32 %v1372_v11, %v1360_v30  ;;  %v1378_v40 = vmul.f32 %v1372_v11, %v1361_v34 }
 0x4f5   :  { %v1385_v41 = vmul.f32 %v1383_v35, %v1373_v53  ;;  %v1386_v21 = vmul.f32 %v1383_v35, %v1374_v56  ;;  %v1387_v16 = vmul.f32 %v1383_v35, %v1375_v22  ;;  %v1388_v63 = vmul.f32 %v1383_v35, %v1376_v51 }
 0x4f6   :  { %v1389_v5 = vmul.f32 %v1383_v35, %v1377_v61  ;;  %v1390_v59 = vmul.f32 %v1383_v35, %v1378_v40 }
 0x4f7   :  { %v1397_v27 = vadd.f32 %v1395_v14, %v1385_v41  ;;  %v1398_v32 = vadd.f32 %v1395_v14, %v1386_v21  ;;  %v1399_v52 = vadd.f32 %v1395_v14, %v1387_v16  ;;  %v1400_v20 = vadd.f32 %v1395_v14, %v1388_v63 }
 0x4f8   :  { %v1401_v43 = vadd.f32 %v1395_v14, %v1389_v5  ;;  %v1402_v54 = vadd.f32 %v1395_v14, %v1390_v59 }
 0x4f9   :  { %v1403_v55 = vadd.f32 %v1397_v27, %v1817_v3  ;;  %v1404_v10 = vadd.f32 %v1398_v32, %v1819_v4  ;;  %v1405_v29 = vadd.f32 %v1399_v52, %v1821_v6  ;;  %v1406_v31 = vadd.f32 %v1400_v20, %v1823_v7 }
 0x4fa   :  { %v1407_v25 = vadd.f32 %v1401_v43, %v1834_v12  ;;  %v1408_v1 = vadd.f32 %v1402_v54, %v1836_v13 }
 0x4fb   :  { %1409 = vst [vmem:[#allocation5] sm:$0xff] %v1403_v55 }
 0x4fc   :  { %1410 = vst [vmem:[#allocation5 + $0x8] sm:$0xff] %v1404_v10 }
 0x4fd   :  { %1411 = vst [vmem:[#allocation5 + $0x10] sm:$0xff] %v1405_v29 }
 0x4fe   :  { %1412 = vst [vmem:[#allocation5 + $0x18] sm:$0xff] %v1406_v31 }
 0x4ff   :  { %1413 = vst [vmem:[#allocation5 + $0x20] sm:$0xff] %v1407_v25 }
 0x500   :  { %1414 = vst [vmem:[#allocation5 + $0x28] sm:$0xff] %v1408_v1 }
 0x501   :  { %1425 = dma.vmem_to_hbm [thread:$0]  %s1421_s6, 768, %s1423_s24, [#allocation4]  }
 0x502   :  { %1759 = dma.done.wait [#allocation4], 768  }
 0x503   :  { %1760 = vsyncadd [#allocation4], 4294966528 }
 0x504   :  { %1430 = vsyncpa [#allocation3], 1 }
 0x505   :  { %1431 = vsyncpa [#allocation4], 1 }

</bundles_post_ra>
